<compile_context>
chip_gen: v5e
topology: v5e:2x2
jax: 0.10.0
libtpu: 0.0.40
codegen_flags: <defaults>
</compile_context>

<pallas_src>
import functools
import math

import jax
import jax.numpy as jnp
from jax.experimental import pallas as pl
from jax.experimental.pallas import tpu as pltpu


# ----------------------------- tiling helpers -------------------------------

def _pick_tile(dim, candidates):
    """Largest candidate that evenly divides dim; else the full dim (small shapes)."""
    for c in candidates:
        if dim >= c and dim % c == 0:
            return c
    return dim


# ------------------------- tiled linear (matmul) kernel ----------------------

def _matmul_kernel(x_ref, w_ref, b_ref, o_ref, acc_ref, *, activation):
    @pl.when(pl.program_id(2) == 0)
    def _():
        acc_ref[...] = jnp.zeros_like(acc_ref)

    acc_ref[...] += jnp.dot(x_ref[...], w_ref[...],
                            preferred_element_type=jnp.float32)

    @pl.when(pl.program_id(2) == pl.num_programs(2) - 1)
    def _():
        y = acc_ref[...] + b_ref[...].astype(jnp.float32)
        if activation == "relu":
            y = jnp.maximum(y, 0.0)
        o_ref[...] = y.astype(o_ref.dtype)


def linear_pallas(x, w, b, activation=None, out_dtype=jnp.bfloat16):
    """x: (M, K), w: (K, N) bf16, b: (N,) f32 -> (M, N) out_dtype.

    bf16 MXU operands with fp32 VMEM accumulation; K-axis reduction pipelined."""
    M, K = x.shape
    N = w.shape[1]
    x = x.astype(jnp.bfloat16)
    w = w.astype(jnp.bfloat16)
    b2 = b.astype(jnp.float32).reshape(1, N)

    # 512/256 tiles fill the 256x256 MXU on v6e/v7x; still 128-granular for v5e.
    tm = _pick_tile(M, (512, 256, 128))
    tn = _pick_tile(N, (512, 256, 128))
    tk = _pick_tile(K, (512, 256, 128))
    grid = (M // tm, N // tn, K // tk)

    return pl.pallas_call(
        functools.partial(_matmul_kernel, activation=activation),
        out_shape=jax.ShapeDtypeStruct((M, N), out_dtype),
        grid=grid,
        in_specs=[
            pl.BlockSpec((tm, tk), lambda i, j, k: (i, k)),
            pl.BlockSpec((tk, tn), lambda i, j, k: (k, j)),
            pl.BlockSpec((1, tn), lambda i, j, k: (0, j)),
        ],
        out_specs=pl.BlockSpec((tm, tn), lambda i, j, k: (i, j)),
        scratch_shapes=[pltpu.VMEM((tm, tn), jnp.float32)],
        compiler_params=pltpu.CompilerParams(
            dimension_semantics=("parallel", "parallel", "arbitrary"),
            vmem_limit_bytes=32 * 1024 * 1024),
    )(x, w, b2)


# --------------------- fused residual-add + LayerNorm kernel -----------------

def _add_layernorm_kernel(x_ref, r_ref, g_ref, b_ref, o_ref, *, eps):
    x = x_ref[...].astype(jnp.float32) + r_ref[...].astype(jnp.float32)
    # one-pass stats: the two lane reductions are independent (var = E[x^2]-mean^2)
    mean = jnp.mean(x, axis=-1, keepdims=True)
    mean_sq = jnp.mean(x * x, axis=-1, keepdims=True)
    var = mean_sq - mean * mean
    xhat = (x - mean) * jax.lax.rsqrt(var + eps)
    y = xhat * g_ref[...].astype(jnp.float32) + b_ref[...].astype(jnp.float32)
    o_ref[...] = y.astype(o_ref.dtype)


def add_layernorm_pallas(x, res, gamma, beta, eps=1e-5, out_dtype=jnp.bfloat16):
    """LayerNorm(x + res): x/res (M, D), gamma/beta (D,) -> (M, D)."""
    M, D = x.shape
    # cap row tile at 512 so double-buffered blocks stay small on v5e/v7x
    tm = _pick_tile(M, (512, 256, 128, 64, 32, 16, 8))
    return pl.pallas_call(
        functools.partial(_add_layernorm_kernel, eps=eps),
        out_shape=jax.ShapeDtypeStruct((M, D), out_dtype),
        grid=(M // tm,),
        in_specs=[
            pl.BlockSpec((tm, D), lambda i: (i, 0)),
            pl.BlockSpec((tm, D), lambda i: (i, 0)),
            pl.BlockSpec((1, D), lambda i: (0, 0)),
            pl.BlockSpec((1, D), lambda i: (0, 0)),
        ],
        out_specs=pl.BlockSpec((tm, D), lambda i: (i, 0)),
        compiler_params=pltpu.CompilerParams(
            dimension_semantics=("parallel",),
            vmem_limit_bytes=32 * 1024 * 1024),
    )(x, res, gamma.reshape(1, D).astype(jnp.float32),
      beta.reshape(1, D).astype(jnp.float32))


# -------------------------- attention kernel ---------------------------------

def _attn_kernel(q_ref, k_ref, v_ref, m_ref, *out_refs, scale, causal,
                 with_probs, q_block):
    o_ref = out_refs[0]
    p_ref = out_refs[1] if with_probs else None

    q = q_ref[0, 0]                      # (tq, Dh) bf16, one head
    k = k_ref[0, 0]                      # (Lk, Dh)
    v = v_ref[0, 0]                      # (Lk, Dh)

    # scores: contract the head dims directly (no k.T / XLU transpose)
    s = jax.lax.dot_general(q, k, (((1,), (1,)), ((), ())),
                            preferred_element_type=jnp.float32) * scale

    # key-pad mask (tiny (1, Lk) vector) + in-kernel causal mask via iota,
    # built once per grid step (one head x one q tile).
    keep = jnp.broadcast_to(m_ref[0] > 0.5, s.shape)
    if causal:
        rows = (jax.lax.broadcasted_iota(jnp.int32, s.shape, 0)
                + pl.program_id(2) * q_block)
        cols = jax.lax.broadcasted_iota(jnp.int32, s.shape, 1)
        keep = jnp.logical_and(keep, rows >= cols)
    s = jnp.where(keep, s, jnp.float32(-10000.0))  # matches torch masked_fill

    s = s - jnp.max(s, axis=-1, keepdims=True)
    e = jnp.exp(s)
    denom = jnp.sum(e, axis=-1, keepdims=True)
    if with_probs:
        p = e / denom                    # exact reciprocal for returned probs
        p_ref[0, 0] = p.astype(p_ref.dtype)
    else:
        p = e * pl.reciprocal(denom, approx=True)

    # context written straight to this head's lane-dense output block
    o_ref[0, 0] = jnp.dot(p.astype(v.dtype), v,
                          preferred_element_type=jnp.float32).astype(o_ref.dtype)


def sdpa_pallas(q, k, v, key_mask, causal=False, with_probs=False):
    """q/k/v: head-split (B, H, L, Dh); key_mask: (B, 1, Lk) float (1 = keep).

    Returns context (B, H, Lq, Dh) bf16 and optionally probs (B, H, Lq, Lk) f32."""
    B, H, Lq, Dh = q.shape
    Lk = k.shape[2]
    scale = 1.0 / math.sqrt(Dh)
    tq = _pick_tile(Lq, (512, 256, 128))
    grid = (B, H, Lq // tq)

    ctx_shape = jax.ShapeDtypeStruct((B, H, Lq, Dh), jnp.bfloat16)
    ctx_spec = pl.BlockSpec((1, 1, tq, Dh), lambda b, h, qi: (b, h, qi, 0))
    if with_probs:
        out_shape = (ctx_shape,
                     jax.ShapeDtypeStruct((B, H, Lq, Lk), jnp.float32))
        out_specs = (ctx_spec,
                     pl.BlockSpec((1, 1, tq, Lk), lambda b, h, qi: (b, h, qi, 0)))
    else:
        out_shape = ctx_shape
        out_specs = ctx_spec

    return pl.pallas_call(
        functools.partial(_attn_kernel, scale=scale, causal=causal,
                          with_probs=with_probs, q_block=tq),
        out_shape=out_shape,
        grid=grid,
        in_specs=[
            pl.BlockSpec((1, 1, tq, Dh), lambda b, h, qi: (b, h, qi, 0)),
            pl.BlockSpec((1, 1, Lk, Dh), lambda b, h, qi: (b, h, 0, 0)),
            pl.BlockSpec((1, 1, Lk, Dh), lambda b, h, qi: (b, h, 0, 0)),
            pl.BlockSpec((1, 1, Lk), lambda b, h, qi: (b, 0, 0)),
        ],
        out_specs=out_specs,
        compiler_params=pltpu.CompilerParams(
            dimension_semantics=("parallel", "parallel", "parallel"),
            vmem_limit_bytes=32 * 1024 * 1024),
    )(q.astype(jnp.bfloat16), k.astype(jnp.bfloat16), v.astype(jnp.bfloat16),
      key_mask.astype(jnp.float32))


# --------------------------- model building blocks ---------------------------

def _split_heads(x, n_head):
    B, L, D = x.shape
    return x.reshape(B, L, n_head, D // n_head).transpose(0, 2, 1, 3)


def _merge_heads(x):
    B, H, L, Dh = x.shape
    return x.transpose(0, 2, 1, 3).reshape(B, L, H * Dh)


def multi_head_attention(p, q_in, kv_in, key_mask, n_head, causal=False,
                         with_probs=False):
    """Separate Q/K/V projections (no host-side last-axis slicing) + per-head SDPA."""
    B, Lq, D = q_in.shape
    Lk = kv_in.shape[1]
    q = linear_pallas(q_in.reshape(B * Lq, D), p["wq"], p["bq"]).reshape(B, Lq, D)
    k = linear_pallas(kv_in.reshape(B * Lk, D), p["wk"], p["bk"]).reshape(B, Lk, D)
    v = linear_pallas(kv_in.reshape(B * Lk, D), p["wv"], p["bv"]).reshape(B, Lk, D)
    out = sdpa_pallas(_split_heads(q, n_head), _split_heads(k, n_head),
                      _split_heads(v, n_head), key_mask,
                      causal=causal, with_probs=with_probs)
    ctx, probs = (out if with_probs else (out, None))
    ctx = _merge_heads(ctx)
    y = linear_pallas(ctx.reshape(B * Lq, D), p["wo"], p["bo"]).reshape(B, Lq, D)
    return y, probs


def feed_forward(p, x):
    B, L, D = x.shape
    h = linear_pallas(x.reshape(B * L, D), p["w1"], p["b1"], activation="relu")
    y = linear_pallas(h, p["w2"], p["b2"])
    return y.reshape(B, L, D)


def encoder_layer(p, x, src_key_mask, n_head):
    B, L, D = x.shape
    a, _ = multi_head_attention(p["attn"], x, x, src_key_mask, n_head,
                                causal=False)
    x = add_layernorm_pallas(a.reshape(B * L, D), x.reshape(B * L, D),
                             p["norm1_g"], p["norm1_b"]).reshape(B, L, D)
    f = feed_forward(p["ffn"], x)
    x = add_layernorm_pallas(f.reshape(B * L, D), x.reshape(B * L, D),
                             p["norm2_g"], p["norm2_b"]).reshape(B, L, D)
    return x


def decoder_layer(p, x, enc, trg_key_mask, src_key_mask, n_head, want_probs):
    B, L, D = x.shape
    a, _ = multi_head_attention(p["self_attn"], x, x, trg_key_mask, n_head,
                                causal=True)
    x = add_layernorm_pallas(a.reshape(B * L, D), x.reshape(B * L, D),
                             p["norm1_g"], p["norm1_b"]).reshape(B, L, D)
    a, cross_probs = multi_head_attention(p["cross_attn"], x, enc, src_key_mask,
                                          n_head, causal=False,
                                          with_probs=want_probs)
    x = add_layernorm_pallas(a.reshape(B * L, D), x.reshape(B * L, D),
                             p["norm2_g"], p["norm2_b"]).reshape(B, L, D)
    f = feed_forward(p["ffn"], x)
    x = add_layernorm_pallas(f.reshape(B * L, D), x.reshape(B * L, D),
                             p["norm3_g"], p["norm3_b"]).reshape(B, L, D)
    return x, cross_probs


def sinusoidal_pos_encoding(max_len, d_model):
    pos = jnp.arange(max_len, dtype=jnp.float32)[:, None]
    two_i = jnp.arange(0, d_model, 2, dtype=jnp.float32)[None, :]
    angle = pos / jnp.power(10000.0, two_i / d_model)
    pe = jnp.zeros((max_len, d_model), jnp.float32)
    pe = pe.at[:, 0::2].set(jnp.sin(angle))
    pe = pe.at[:, 1::2].set(jnp.cos(angle))
    return pe


def transformer_embedding(tok_table, pos_enc, ids):
    # embedding gather + positional add are plain-JAX glue
    tok = jnp.take(tok_table, ids, axis=0)          # (B, L, D)
    L = ids.shape[1]
    return (tok + pos_enc[:L][None, :, :]).astype(jnp.bfloat16)


def transformer_forward(params, src, trg, cfg):
    n_head = cfg["n_head"]
    B, Ls = src.shape
    Lt = trg.shape[1]
    # key-pad masks only (B,1,L); the causal part is built inside the kernel.
    src_key_mask = (src != cfg["src_pad_idx"]).astype(jnp.float32).reshape(B, 1, Ls)
    trg_key_mask = (trg != cfg["trg_pad_idx"]).astype(jnp.float32).reshape(B, 1, Lt)

    x = transformer_embedding(params["enc_tok"], params["pos_enc"], src)
    for lp in params["enc_layers"]:
        x = encoder_layer(lp, x, src_key_mask, n_head)
    enc_src = x

    y = transformer_embedding(params["dec_tok"], params["pos_enc"], trg)
    attention = None
    n_dec = len(params["dec_layers"])
    for li, lp in enumerate(params["dec_layers"]):
        want = (li == n_dec - 1)   # only the last layer writes probs to HBM
        y, probs = decoder_layer(lp, y, enc_src, trg_key_mask, src_key_mask,
                                 n_head, want)
        if want:
            attention = probs

    D = y.shape[-1]
    out = linear_pallas(y.reshape(B * Lt, D), params["out_w"], params["out_b"],
                        out_dtype=jnp.float32).reshape(B, Lt, -1)
    return out, attention


# --------------------------- deterministic init ------------------------------

def init_params(key, cfg):
    d = cfg["d_model"]
    ffn = cfg["ffn_hidden"]
    counter = [0]
    keys = jax.random.split(key, 4096)

    def nk():
        counter[0] += 1
        return keys[counter[0] - 1]

    def dense(fan_in, fan_out):
        w = 0.02 * jax.random.normal(nk(), (fan_in, fan_out), jnp.float32)
        return w.astype(jnp.bfloat16), jnp.zeros((fan_out,), jnp.float32)

    def attn_params():
        wq, bq = dense(d, d)
        wk, bk = dense(d, d)
        wv, bv = dense(d, d)
        wo, bo = dense(d, d)
        return dict(wq=wq, bq=bq, wk=wk, bk=bk, wv=wv, bv=bv, wo=wo, bo=bo)

    def ffn_params():
        w1, b1 = dense(d, ffn)
        w2, b2 = dense(ffn, d)
        return dict(w1=w1, b1=b1, w2=w2, b2=b2)

    def ln():
        return jnp.ones((d,), jnp.float32), jnp.zeros((d,), jnp.float32)

    enc_layers = []
    for _ in range(cfg["n_layers"]):
        g1, b1 = ln()
        g2, b2 = ln()
        enc_layers.append(dict(attn=attn_params(), ffn=ffn_params(),
                               norm1_g=g1, norm1_b=b1, norm2_g=g2, norm2_b=b2))

    dec_layers = []
    for _ in range(cfg["n_layers"]):
        g1, b1 = ln()
        g2, b2 = ln()
        g3, b3 = ln()
        dec_layers.append(dict(self_attn=attn_params(),
                               cross_attn=attn_params(),
                               ffn=ffn_params(),
                               norm1_g=g1, norm1_b=b1,
                               norm2_g=g2, norm2_b=b2,
                               norm3_g=g3, norm3_b=b3))

    out_w, out_b = dense(d, cfg["dec_voc_size"])
    return dict(
        enc_tok=0.02 * jax.random.normal(nk(), (cfg["enc_voc_size"], d), jnp.float32),
        dec_tok=0.02 * jax.random.normal(nk(), (cfg["dec_voc_size"], d), jnp.float32),
        pos_enc=sinusoidal_pos_encoding(cfg["max_len"], d),
        enc_layers=enc_layers, dec_layers=dec_layers,
        out_w=out_w, out_b=out_b,
    )


# --------------------------------- main ---------------------------------------

if __name__ == "__main__":
    cfg = dict(src_pad_idx=0, trg_pad_idx=0,
               enc_voc_size=50, dec_voc_size=60,
               d_model=32, n_head=4, max_len=16,
               ffn_hidden=64, n_layers=2, drop_prob=0.1)

    key = jax.random.PRNGKey(0)
    k_param, k_src, k_trg = jax.random.split(key, 3)
    params = init_params(k_param, cfg)

    B, Ls, Lt = 2, 8, 8
    src = jax.random.randint(k_src, (B, Ls), 0, cfg["enc_voc_size"], dtype=jnp.int32)
    trg = jax.random.randint(k_trg, (B, Lt), 0, cfg["dec_voc_size"], dtype=jnp.int32)

    fwd = jax.jit(lambda p, s, t: transformer_forward(p, s, t, cfg))
    output, attention = fwd(params, src, trg)
    jax.block_until_ready(output)
    jax.block_until_ready(attention)

    assert output.shape == (B, Lt, cfg["dec_voc_size"])
    assert attention.shape == (B, cfg["n_head"], Lt, Ls)
    print("KERNEL_OK")
</pallas_src>

<mosaic_0001>
module attributes {stable_mosaic.version = 11 : i64} {
  func.func @_attn_kernel(%arg0: i32, %arg1: i32, %arg2: i32, %arg3: memref<1x1x8x8xbf16, #tpu.memory_space<vmem>>, %arg4: memref<1x1x8x8xbf16, #tpu.memory_space<vmem>>, %arg5: memref<1x1x8x8xbf16, #tpu.memory_space<vmem>>, %arg6: memref<1x1x8xf32, #tpu.memory_space<vmem>>, %arg7: memref<1x1x8x8xbf16, #tpu.memory_space<vmem>>) attributes {dimension_semantics = [#tpu.dimension_semantics<parallel>, #tpu.dimension_semantics<parallel>, #tpu.dimension_semantics<parallel>], iteration_bounds = array<i64: 2, 4, 1>, scalar_prefetch = 0 : i64, scratch_operands = 0 : i64, tpu.core_type = #tpu.core_type<tc>, window_params = [{transform_indices = @transform_0, window_bounds = array<i64: 1, 1, 8, 8>}, {transform_indices = @transform_1, window_bounds = array<i64: 1, 1, 8, 8>}, {transform_indices = @transform_2, window_bounds = array<i64: 1, 1, 8, 8>}, {transform_indices = @transform_3, window_bounds = array<i64: 1, 1, 8>}, {transform_indices = @transform_4, window_bounds = array<i64: 1, 1, 8, 8>}]} {
    %c0 = arith.constant 0 : index
    %c0_0 = arith.constant 0 : index
    %c0_1 = arith.constant 0 : index
    %c0_2 = arith.constant 0 : index
    %0 = vector.load %arg3[%c0, %c0_0, %c0_1, %c0_2] : memref<1x1x8x8xbf16, #tpu.memory_space<vmem>>, vector<1x1x8x8xbf16>
    %1 = vector.shape_cast %0 : vector<1x1x8x8xbf16> to vector<8x8xbf16>
    %c0_3 = arith.constant 0 : index
    %c0_4 = arith.constant 0 : index
    %c0_5 = arith.constant 0 : index
    %c0_6 = arith.constant 0 : index
    %2 = vector.load %arg4[%c0_3, %c0_4, %c0_5, %c0_6] : memref<1x1x8x8xbf16, #tpu.memory_space<vmem>>, vector<1x1x8x8xbf16>
    %3 = vector.shape_cast %2 : vector<1x1x8x8xbf16> to vector<8x8xbf16>
    %c0_7 = arith.constant 0 : index
    %c0_8 = arith.constant 0 : index
    %c0_9 = arith.constant 0 : index
    %c0_10 = arith.constant 0 : index
    %4 = vector.load %arg5[%c0_7, %c0_8, %c0_9, %c0_10] : memref<1x1x8x8xbf16, #tpu.memory_space<vmem>>, vector<1x1x8x8xbf16>
    %5 = vector.shape_cast %4 : vector<1x1x8x8xbf16> to vector<8x8xbf16>
    %cst = arith.constant dense<0.000000e+00> : vector<8x8xf32>
    %6 = tpu.matmul %1, %3, %cst {dimension_numbers = #tpu.dot_dimension_numbers<[1], [1], [0], [0], [0, 0, 1, 0], [], []>} : vector<8x8xbf16>, vector<8x8xbf16>, vector<8x8xf32> -> vector<8x8xf32>
    %cst_11 = arith.constant 0.353553385 : f32
    %7 = vector.broadcast %cst_11 : f32 to vector<8x8xf32>
    %8 = arith.mulf %6, %7 : vector<8x8xf32>
    %c0_12 = arith.constant 0 : index
    %c0_13 = arith.constant 0 : index
    %c0_14 = arith.constant 0 : index
    %9 = vector.load %arg6[%c0_12, %c0_13, %c0_14] : memref<1x1x8xf32, #tpu.memory_space<vmem>>, vector<1x1x8xf32>
    %10 = vector.shape_cast %9 : vector<1x1x8xf32> to vector<1x8xf32>
    %cst_15 = arith.constant 5.000000e-01 : f32
    %11 = vector.broadcast %cst_15 : f32 to vector<1x8xf32>
    %12 = arith.cmpf ogt, %10, %11 : vector<1x8xf32>
    %13 = vector.shape_cast %12 : vector<1x8xi1> to vector<1x8xi1>
    %14 = vector.broadcast %13 : vector<1x8xi1> to vector<8x8xi1>
    %15 = tpu.iota {dimensions = array<i32: 0>} : vector<8x8xi32>
    %c8_i32 = arith.constant 8 : i32
    %16 = arith.muli %arg2, %c8_i32 : i32
    %17 = vector.broadcast %16 : i32 to vector<8x8xi32>
    %18 = arith.addi %15, %17 : vector<8x8xi32>
    %19 = tpu.iota {dimensions = array<i32: 1>} : vector<8x8xi32>
    %20 = arith.cmpi sge, %18, %19 : vector<8x8xi32>
    %21 = arith.andi %14, %20 : vector<8x8xi1>
    %cst_16 = arith.constant -1.000000e+04 : f32
    %22 = vector.broadcast %cst_16 : f32 to vector<8x8xf32>
    %23 = arith.select %21, %8, %22 : vector<8x8xi1>, vector<8x8xf32>
    %cst_17 = arith.constant dense<0xFF800000> : vector<8xf32>
    %24 = vector.multi_reduction <maximumf>, %23, %cst_17 [1] : vector<8x8xf32> to vector<8xf32>
    %25 = vector.shape_cast %24 : vector<8xf32> to vector<8x1xf32>
    %26 = vector.broadcast %25 : vector<8x1xf32> to vector<8x8xf32>
    %27 = arith.subf %23, %26 : vector<8x8xf32>
    %28 = math.exp %27 : vector<8x8xf32>
    %cst_18 = arith.constant dense<0.000000e+00> : vector<8xf32>
    %29 = vector.multi_reduction <add>, %28, %cst_18 [1] : vector<8x8xf32> to vector<8xf32>
    %30 = vector.shape_cast %29 : vector<8xf32> to vector<8x1xf32>
    %31 = tpu.reciprocal %30 {approx = true} : vector<8x1xf32> -> vector<8x1xf32>
    %32 = vector.broadcast %31 : vector<8x1xf32> to vector<8x8xf32>
    %33 = arith.mulf %28, %32 : vector<8x8xf32>
    %34 = arith.truncf %33 : vector<8x8xf32> to vector<8x8xbf16>
    %cst_19 = arith.constant dense<0.000000e+00> : vector<8x8xf32>
    %35 = tpu.matmul %34, %5, %cst_19 {dimension_numbers = #tpu.dot_dimension_numbers<[1], [0], [0], [1], [0, 0, 1, 1], [], []>} : vector<8x8xbf16>, vector<8x8xbf16>, vector<8x8xf32> -> vector<8x8xf32>
    %36 = arith.truncf %35 : vector<8x8xf32> to vector<8x8xbf16>
    %c0_20 = arith.constant 0 : index
    %c0_21 = arith.constant 0 : index
    %c0_22 = arith.constant 0 : index
    %c0_23 = arith.constant 0 : index
    %37 = vector.load %arg7[%c0_20, %c0_21, %c0_22, %c0_23] : memref<1x1x8x8xbf16, #tpu.memory_space<vmem>>, vector<1x1x8x8xbf16>
    %38 = vector.shape_cast %37 : vector<1x1x8x8xbf16> to vector<8x8xbf16>
    %39 = vector.shape_cast %36 : vector<8x8xbf16> to vector<1x1x8x8xbf16>
    tpu.vector_store %arg7[%c0_20, %c0_21, %c0_22, %c0_23], %39 {strides = array<i32>} : memref<1x1x8x8xbf16, #tpu.memory_space<vmem>>, vector<1x1x8x8xbf16>,
    return
  }
  func.func @transform_0(%arg0: i32, %arg1: i32, %arg2: i32) -> (i32, i32, i32, i32) {
    %c0_i32 = arith.constant 0 : i32
    %c0_i32_0 = arith.constant 0 : i32
    return %arg0, %arg1, %arg2, %c0_i32 : i32, i32, i32, i32
  }
  func.func @transform_1(%arg0: i32, %arg1: i32, %arg2: i32) -> (i32, i32, i32, i32) {
    %c0_i32 = arith.constant 0 : i32
    %c0_i32_0 = arith.constant 0 : i32
    %c0_i32_1 = arith.constant 0 : i32
    return %arg0, %arg1, %c0_i32, %c0_i32_0 : i32, i32, i32, i32
  }
  func.func @transform_2(%arg0: i32, %arg1: i32, %arg2: i32) -> (i32, i32, i32, i32) {
    %c0_i32 = arith.constant 0 : i32
    %c0_i32_0 = arith.constant 0 : i32
    %c0_i32_1 = arith.constant 0 : i32
    return %arg0, %arg1, %c0_i32, %c0_i32_0 : i32, i32, i32, i32
  }
  func.func @transform_3(%arg0: i32, %arg1: i32, %arg2: i32) -> (i32, i32, i32) {
    %c0_i32 = arith.constant 0 : i32
    %c0_i32_0 = arith.constant 0 : i32
    %c0_i32_1 = arith.constant 0 : i32
    return %arg0, %c0_i32, %c0_i32_0 : i32, i32, i32
  }
  func.func @transform_4(%arg0: i32, %arg1: i32, %arg2: i32) -> (i32, i32, i32, i32) {
    %c0_i32 = arith.constant 0 : i32
    %c0_i32_0 = arith.constant 0 : i32
    return %arg0, %arg1, %arg2, %c0_i32 : i32, i32, i32, i32
  }
}

module attributes {stable_mosaic.version = 11 : i64} {
  func.func @_add_layernorm_kernel(%arg0: i32, %arg1: memref<16x32xbf16, #tpu.memory_space<vmem>>, %arg2: memref<16x32xbf16, #tpu.memory_space<vmem>>, %arg3: memref<1x32xf32, #tpu.memory_space<vmem>>, %arg4: memref<1x32xf32, #tpu.memory_space<vmem>>, %arg5: memref<16x32xbf16, #tpu.memory_space<vmem>>) attributes {dimension_semantics = [#tpu.dimension_semantics<parallel>], iteration_bounds = array<i64: 1>, scalar_prefetch = 0 : i64, scratch_operands = 0 : i64, tpu.core_type = #tpu.core_type<tc>, window_params = [{transform_indices = @transform_0, window_bounds = array<i64: 16, 32>}, {transform_indices = @transform_1, window_bounds = array<i64: 16, 32>}, {pipeline_mode = #tpu.pipeline_mode<synchronous>, transform_indices = @transform_2, window_bounds = array<i64: 1, 32>}, {pipeline_mode = #tpu.pipeline_mode<synchronous>, transform_indices = @transform_3, window_bounds = array<i64: 1, 32>}, {transform_indices = @transform_4, window_bounds = array<i64: 16, 32>}]} {
    %c0 = arith.constant 0 : index
    %c0_0 = arith.constant 0 : index
    %0 = vector.load %arg1[%c0, %c0_0] : memref<16x32xbf16, #tpu.memory_space<vmem>>, vector<16x32xbf16>
    %1 = arith.extf %0 : vector<16x32xbf16> to vector<16x32xf32>
    %c0_1 = arith.constant 0 : index
    %c0_2 = arith.constant 0 : index
    %2 = vector.load %arg2[%c0_1, %c0_2] : memref<16x32xbf16, #tpu.memory_space<vmem>>, vector<16x32xbf16>
    %3 = arith.extf %2 : vector<16x32xbf16> to vector<16x32xf32>
    %4 = arith.addf %1, %3 : vector<16x32xf32>
    %cst = arith.constant dense<0.000000e+00> : vector<16xf32>
    %5 = vector.multi_reduction <add>, %4, %cst [1] : vector<16x32xf32> to vector<16xf32>
    %6 = vector.shape_cast %5 : vector<16xf32> to vector<16x1xf32>
    %cst_3 = arith.constant 3.200000e+01 : f32
    %7 = vector.broadcast %cst_3 : f32 to vector<16x1xf32>
    %8 = arith.divf %6, %7 : vector<16x1xf32>
    %9 = arith.mulf %4, %4 : vector<16x32xf32>
    %cst_4 = arith.constant dense<0.000000e+00> : vector<16xf32>
    %10 = vector.multi_reduction <add>, %9, %cst_4 [1] : vector<16x32xf32> to vector<16xf32>
    %11 = vector.shape_cast %10 : vector<16xf32> to vector<16x1xf32>
    %cst_5 = arith.constant 3.200000e+01 : f32
    %12 = vector.broadcast %cst_5 : f32 to vector<16x1xf32>
    %13 = arith.divf %11, %12 : vector<16x1xf32>
    %14 = arith.mulf %8, %8 : vector<16x1xf32>
    %15 = arith.subf %13, %14 : vector<16x1xf32>
    %16 = vector.broadcast %8 : vector<16x1xf32> to vector<16x32xf32>
    %17 = arith.subf %4, %16 : vector<16x32xf32>
    %cst_6 = arith.constant 9.99999974E-6 : f32
    %18 = vector.broadcast %cst_6 : f32 to vector<16x1xf32>
    %19 = arith.addf %15, %18 : vector<16x1xf32>
    %20 = math.rsqrt %19 : vector<16x1xf32>
    %21 = vector.broadcast %20 : vector<16x1xf32> to vector<16x32xf32>
    %22 = arith.mulf %17, %21 : vector<16x32xf32>
    %c0_7 = arith.constant 0 : index
    %c0_8 = arith.constant 0 : index
    %23 = vector.load %arg3[%c0_7, %c0_8] : memref<1x32xf32, #tpu.memory_space<vmem>>, vector<1x32xf32>
    %24 = vector.broadcast %23 : vector<1x32xf32> to vector<16x32xf32>
    %25 = arith.mulf %22, %24 : vector<16x32xf32>
    %c0_9 = arith.constant 0 : index
    %c0_10 = arith.constant 0 : index
    %26 = vector.load %arg4[%c0_9, %c0_10] : memref<1x32xf32, #tpu.memory_space<vmem>>, vector<1x32xf32>
    %27 = vector.broadcast %26 : vector<1x32xf32> to vector<16x32xf32>
    %28 = arith.addf %25, %27 : vector<16x32xf32>
    %29 = arith.truncf %28 : vector<16x32xf32> to vector<16x32xbf16>
    %c0_11 = arith.constant 0 : index
    %c0_12 = arith.constant 0 : index
    %30 = vector.load %arg5[%c0_11, %c0_12] : memref<16x32xbf16, #tpu.memory_space<vmem>>, vector<16x32xbf16>
    tpu.vector_store %arg5[%c0_11, %c0_12], %29 {strides = array<i32>} : memref<16x32xbf16, #tpu.memory_space<vmem>>, vector<16x32xbf16>,
    return
  }
  func.func @transform_0(%arg0: i32) -> (i32, i32) {
    %c0_i32 = arith.constant 0 : i32
    %c0_i32_0 = arith.constant 0 : i32
    return %arg0, %c0_i32 : i32, i32
  }
  func.func @transform_1(%arg0: i32) -> (i32, i32) {
    %c0_i32 = arith.constant 0 : i32
    %c0_i32_0 = arith.constant 0 : i32
    return %arg0, %c0_i32 : i32, i32
  }
  func.func @transform_2(%arg0: i32) -> (i32, i32) {
    %c0_i32 = arith.constant 0 : i32
    %c0_i32_0 = arith.constant 0 : i32
    %c0_i32_1 = arith.constant 0 : i32
    return %c0_i32, %c0_i32_0 : i32, i32
  }
  func.func @transform_3(%arg0: i32) -> (i32, i32) {
    %c0_i32 = arith.constant 0 : i32
    %c0_i32_0 = arith.constant 0 : i32
    %c0_i32_1 = arith.constant 0 : i32
    return %c0_i32, %c0_i32_0 : i32, i32
  }
  func.func @transform_4(%arg0: i32) -> (i32, i32) {
    %c0_i32 = arith.constant 0 : i32
    %c0_i32_0 = arith.constant 0 : i32
    return %arg0, %c0_i32 : i32, i32
  }
}

module attributes {stable_mosaic.version = 11 : i64} {
  func.func @_matmul_kernel(%arg0: i32, %arg1: i32, %arg2: i32, %arg3: memref<16x32xbf16, #tpu.memory_space<vmem>>, %arg4: memref<32x32xbf16, #tpu.memory_space<vmem>>, %arg5: memref<1x32xf32, #tpu.memory_space<vmem>>, %arg6: memref<16x32xbf16, #tpu.memory_space<vmem>>, %arg7: memref<16x32xf32, #tpu.memory_space<vmem>>) attributes {dimension_semantics = [#tpu.dimension_semantics<parallel>, #tpu.dimension_semantics<parallel>, #tpu.dimension_semantics<arbitrary>], iteration_bounds = array<i64: 1, 1, 1>, scalar_prefetch = 0 : i64, scratch_operands = 1 : i64, tpu.core_type = #tpu.core_type<tc>, window_params = [{transform_indices = @transform_0, window_bounds = array<i64: 16, 32>}, {transform_indices = @transform_1, window_bounds = array<i64: 32, 32>}, {transform_indices = @transform_2, window_bounds = array<i64: 1, 32>}, {transform_indices = @transform_3, window_bounds = array<i64: 16, 32>}]} {
    %c0_i32 = arith.constant 0 : i32
    %0 = arith.cmpi eq, %arg2, %c0_i32 : i32
    %1 = arith.extui %0 : i1 to i32
    %c0_i32_0 = arith.constant 0 : i32
    %2 = arith.cmpi ne, %1, %c0_i32_0 : i32
    scf.if %2 {
      %cst_10 = arith.constant 0.000000e+00 : f32
      %12 = vector.broadcast %cst_10 : f32 to vector<16x32xf32>
      %c0_11 = arith.constant 0 : index
      %c0_12 = arith.constant 0 : index
      %13 = vector.load %arg7[%c0_11, %c0_12] : memref<16x32xf32, #tpu.memory_space<vmem>>, vector<16x32xf32>
      tpu.vector_store %arg7[%c0_11, %c0_12], %12 {strides = array<i32>} : memref<16x32xf32, #tpu.memory_space<vmem>>, vector<16x32xf32>,
    } else {
    }
    %c0 = arith.constant 0 : index
    %c0_1 = arith.constant 0 : index
    %3 = vector.load %arg7[%c0, %c0_1] : memref<16x32xf32, #tpu.memory_space<vmem>>, vector<16x32xf32>
    %c0_2 = arith.constant 0 : index
    %c0_3 = arith.constant 0 : index
    %4 = vector.load %arg3[%c0_2, %c0_3] : memref<16x32xbf16, #tpu.memory_space<vmem>>, vector<16x32xbf16>
    %c0_4 = arith.constant 0 : index
    %c0_5 = arith.constant 0 : index
    %5 = vector.load %arg4[%c0_4, %c0_5] : memref<32x32xbf16, #tpu.memory_space<vmem>>, vector<32x32xbf16>
    %cst = arith.constant dense<0.000000e+00> : vector<16x32xf32>
    %6 = tpu.matmul %4, %5, %cst {dimension_numbers = #tpu.dot_dimension_numbers<[1], [0], [0], [1], [0, 0, 1, 1], [], []>} : vector<16x32xbf16>, vector<32x32xbf16>, vector<16x32xf32> -> vector<16x32xf32>
    %7 = arith.addf %3, %6 : vector<16x32xf32>
    %c0_6 = arith.constant 0 : index
    %c0_7 = arith.constant 0 : index
    %8 = vector.load %arg7[%c0_6, %c0_7] : memref<16x32xf32, #tpu.memory_space<vmem>>, vector<16x32xf32>
    tpu.vector_store %arg7[%c0_6, %c0_7], %7 {strides = array<i32>} : memref<16x32xf32, #tpu.memory_space<vmem>>, vector<16x32xf32>,
    %c0_i32_8 = arith.constant 0 : i32
    %9 = arith.cmpi eq, %arg2, %c0_i32_8 : i32
    %10 = arith.extui %9 : i1 to i32
    %c0_i32_9 = arith.constant 0 : i32
    %11 = arith.cmpi ne, %10, %c0_i32_9 : i32
    scf.if %11 {
      %c0_10 = arith.constant 0 : index
      %c0_11 = arith.constant 0 : index
      %12 = vector.load %arg7[%c0_10, %c0_11] : memref<16x32xf32, #tpu.memory_space<vmem>>, vector<16x32xf32>
      %c0_12 = arith.constant 0 : index
      %c0_13 = arith.constant 0 : index
      %13 = vector.load %arg5[%c0_12, %c0_13] : memref<1x32xf32, #tpu.memory_space<vmem>>, vector<1x32xf32>
      %14 = vector.broadcast %13 : vector<1x32xf32> to vector<16x32xf32>
      %15 = arith.addf %12, %14 : vector<16x32xf32>
      %16 = arith.truncf %15 : vector<16x32xf32> to vector<16x32xbf16>
      %c0_14 = arith.constant 0 : index
      %c0_15 = arith.constant 0 : index
      %17 = vector.load %arg6[%c0_14, %c0_15] : memref<16x32xbf16, #tpu.memory_space<vmem>>, vector<16x32xbf16>
      tpu.vector_store %arg6[%c0_14, %c0_15], %16 {strides = array<i32>} : memref<16x32xbf16, #tpu.memory_space<vmem>>, vector<16x32xbf16>,
    } else {
    }
    return
  }
  func.func @transform_0(%arg0: i32, %arg1: i32, %arg2: i32) -> (i32, i32) {
    %c0_i32 = arith.constant 0 : i32
    return %arg0, %arg2 : i32, i32
  }
  func.func @transform_1(%arg0: i32, %arg1: i32, %arg2: i32) -> (i32, i32) {
    %c0_i32 = arith.constant 0 : i32
    return %arg2, %arg1 : i32, i32
  }
  func.func @transform_2(%arg0: i32, %arg1: i32, %arg2: i32) -> (i32, i32) {
    %c0_i32 = arith.constant 0 : i32
    %c0_i32_0 = arith.constant 0 : i32
    return %c0_i32, %arg1 : i32, i32
  }
  func.func @transform_3(%arg0: i32, %arg1: i32, %arg2: i32) -> (i32, i32) {
    %c0_i32 = arith.constant 0 : i32
    return %arg0, %arg1 : i32, i32
  }
}

module attributes {stable_mosaic.version = 11 : i64} {
  func.func @_attn_kernel(%arg0: i32, %arg1: i32, %arg2: i32, %arg3: memref<1x1x8x8xbf16, #tpu.memory_space<vmem>>, %arg4: memref<1x1x8x8xbf16, #tpu.memory_space<vmem>>, %arg5: memref<1x1x8x8xbf16, #tpu.memory_space<vmem>>, %arg6: memref<1x1x8xf32, #tpu.memory_space<vmem>>, %arg7: memref<1x1x8x8xbf16, #tpu.memory_space<vmem>>) attributes {dimension_semantics = [#tpu.dimension_semantics<parallel>, #tpu.dimension_semantics<parallel>, #tpu.dimension_semantics<parallel>], iteration_bounds = array<i64: 2, 4, 1>, scalar_prefetch = 0 : i64, scratch_operands = 0 : i64, tpu.core_type = #tpu.core_type<tc>, window_params = [{transform_indices = @transform_0, window_bounds = array<i64: 1, 1, 8, 8>}, {transform_indices = @transform_1, window_bounds = array<i64: 1, 1, 8, 8>}, {transform_indices = @transform_2, window_bounds = array<i64: 1, 1, 8, 8>}, {transform_indices = @transform_3, window_bounds = array<i64: 1, 1, 8>}, {transform_indices = @transform_4, window_bounds = array<i64: 1, 1, 8, 8>}]} {
    %c0 = arith.constant 0 : index
    %c0_0 = arith.constant 0 : index
    %c0_1 = arith.constant 0 : index
    %c0_2 = arith.constant 0 : index
    %0 = vector.load %arg3[%c0, %c0_0, %c0_1, %c0_2] : memref<1x1x8x8xbf16, #tpu.memory_space<vmem>>, vector<1x1x8x8xbf16>
    %1 = vector.shape_cast %0 : vector<1x1x8x8xbf16> to vector<8x8xbf16>
    %c0_3 = arith.constant 0 : index
    %c0_4 = arith.constant 0 : index
    %c0_5 = arith.constant 0 : index
    %c0_6 = arith.constant 0 : index
    %2 = vector.load %arg4[%c0_3, %c0_4, %c0_5, %c0_6] : memref<1x1x8x8xbf16, #tpu.memory_space<vmem>>, vector<1x1x8x8xbf16>
    %3 = vector.shape_cast %2 : vector<1x1x8x8xbf16> to vector<8x8xbf16>
    %c0_7 = arith.constant 0 : index
    %c0_8 = arith.constant 0 : index
    %c0_9 = arith.constant 0 : index
    %c0_10 = arith.constant 0 : index
    %4 = vector.load %arg5[%c0_7, %c0_8, %c0_9, %c0_10] : memref<1x1x8x8xbf16, #tpu.memory_space<vmem>>, vector<1x1x8x8xbf16>
    %5 = vector.shape_cast %4 : vector<1x1x8x8xbf16> to vector<8x8xbf16>
    %cst = arith.constant dense<0.000000e+00> : vector<8x8xf32>
    %6 = tpu.matmul %1, %3, %cst {dimension_numbers = #tpu.dot_dimension_numbers<[1], [1], [0], [0], [0, 0, 1, 0], [], []>} : vector<8x8xbf16>, vector<8x8xbf16>, vector<8x8xf32> -> vector<8x8xf32>
    %cst_11 = arith.constant 0.353553385 : f32
    %7 = vector.broadcast %cst_11 : f32 to vector<8x8xf32>
    %8 = arith.mulf %6, %7 : vector<8x8xf32>
    %c0_12 = arith.constant 0 : index
    %c0_13 = arith.constant 0 : index
    %c0_14 = arith.constant 0 : index
    %9 = vector.load %arg6[%c0_12, %c0_13, %c0_14] : memref<1x1x8xf32, #tpu.memory_space<vmem>>, vector<1x1x8xf32>
    %10 = vector.shape_cast %9 : vector<1x1x8xf32> to vector<1x8xf32>
    %cst_15 = arith.constant 5.000000e-01 : f32
    %11 = vector.broadcast %cst_15 : f32 to vector<1x8xf32>
    %12 = arith.cmpf ogt, %10, %11 : vector<1x8xf32>
    %13 = vector.shape_cast %12 : vector<1x8xi1> to vector<1x8xi1>
    %14 = vector.broadcast %13 : vector<1x8xi1> to vector<8x8xi1>
    %cst_16 = arith.constant -1.000000e+04 : f32
    %15 = vector.broadcast %cst_16 : f32 to vector<8x8xf32>
    %16 = arith.select %14, %8, %15 : vector<8x8xi1>, vector<8x8xf32>
    %cst_17 = arith.constant dense<0xFF800000> : vector<8xf32>
    %17 = vector.multi_reduction <maximumf>, %16, %cst_17 [1] : vector<8x8xf32> to vector<8xf32>
    %18 = vector.shape_cast %17 : vector<8xf32> to vector<8x1xf32>
    %19 = vector.broadcast %18 : vector<8x1xf32> to vector<8x8xf32>
    %20 = arith.subf %16, %19 : vector<8x8xf32>
    %21 = math.exp %20 : vector<8x8xf32>
    %cst_18 = arith.constant dense<0.000000e+00> : vector<8xf32>
    %22 = vector.multi_reduction <add>, %21, %cst_18 [1] : vector<8x8xf32> to vector<8xf32>
    %23 = vector.shape_cast %22 : vector<8xf32> to vector<8x1xf32>
    %24 = tpu.reciprocal %23 {approx = true} : vector<8x1xf32> -> vector<8x1xf32>
    %25 = vector.broadcast %24 : vector<8x1xf32> to vector<8x8xf32>
    %26 = arith.mulf %21, %25 : vector<8x8xf32>
    %27 = arith.truncf %26 : vector<8x8xf32> to vector<8x8xbf16>
    %cst_19 = arith.constant dense<0.000000e+00> : vector<8x8xf32>
    %28 = tpu.matmul %27, %5, %cst_19 {dimension_numbers = #tpu.dot_dimension_numbers<[1], [0], [0], [1], [0, 0, 1, 1], [], []>} : vector<8x8xbf16>, vector<8x8xbf16>, vector<8x8xf32> -> vector<8x8xf32>
    %29 = arith.truncf %28 : vector<8x8xf32> to vector<8x8xbf16>
    %c0_20 = arith.constant 0 : index
    %c0_21 = arith.constant 0 : index
    %c0_22 = arith.constant 0 : index
    %c0_23 = arith.constant 0 : index
    %30 = vector.load %arg7[%c0_20, %c0_21, %c0_22, %c0_23] : memref<1x1x8x8xbf16, #tpu.memory_space<vmem>>, vector<1x1x8x8xbf16>
    %31 = vector.shape_cast %30 : vector<1x1x8x8xbf16> to vector<8x8xbf16>
    %32 = vector.shape_cast %29 : vector<8x8xbf16> to vector<1x1x8x8xbf16>
    tpu.vector_store %arg7[%c0_20, %c0_21, %c0_22, %c0_23], %32 {strides = array<i32>} : memref<1x1x8x8xbf16, #tpu.memory_space<vmem>>, vector<1x1x8x8xbf16>,
    return
  }
  func.func @transform_0(%arg0: i32, %arg1: i32, %arg2: i32) -> (i32, i32, i32, i32) {
    %c0_i32 = arith.constant 0 : i32
    %c0_i32_0 = arith.constant 0 : i32
    return %arg0, %arg1, %arg2, %c0_i32 : i32, i32, i32, i32
  }
  func.func @transform_1(%arg0: i32, %arg1: i32, %arg2: i32) -> (i32, i32, i32, i32) {
    %c0_i32 = arith.constant 0 : i32
    %c0_i32_0 = arith.constant 0 : i32
    %c0_i32_1 = arith.constant 0 : i32
    return %arg0, %arg1, %c0_i32, %c0_i32_0 : i32, i32, i32, i32
  }
  func.func @transform_2(%arg0: i32, %arg1: i32, %arg2: i32) -> (i32, i32, i32, i32) {
    %c0_i32 = arith.constant 0 : i32
    %c0_i32_0 = arith.constant 0 : i32
    %c0_i32_1 = arith.constant 0 : i32
    return %arg0, %arg1, %c0_i32, %c0_i32_0 : i32, i32, i32, i32
  }
  func.func @transform_3(%arg0: i32, %arg1: i32, %arg2: i32) -> (i32, i32, i32) {
    %c0_i32 = arith.constant 0 : i32
    %c0_i32_0 = arith.constant 0 : i32
    %c0_i32_1 = arith.constant 0 : i32
    return %arg0, %c0_i32, %c0_i32_0 : i32, i32, i32
  }
  func.func @transform_4(%arg0: i32, %arg1: i32, %arg2: i32) -> (i32, i32, i32, i32) {
    %c0_i32 = arith.constant 0 : i32
    %c0_i32_0 = arith.constant 0 : i32
    return %arg0, %arg1, %arg2, %c0_i32 : i32, i32, i32, i32
  }
}

module attributes {stable_mosaic.version = 11 : i64} {
  func.func @_matmul_kernel(%arg0: i32, %arg1: i32, %arg2: i32, %arg3: memref<16x64xbf16, #tpu.memory_space<vmem>>, %arg4: memref<64x32xbf16, #tpu.memory_space<vmem>>, %arg5: memref<1x32xf32, #tpu.memory_space<vmem>>, %arg6: memref<16x32xbf16, #tpu.memory_space<vmem>>, %arg7: memref<16x32xf32, #tpu.memory_space<vmem>>) attributes {dimension_semantics = [#tpu.dimension_semantics<parallel>, #tpu.dimension_semantics<parallel>, #tpu.dimension_semantics<arbitrary>], iteration_bounds = array<i64: 1, 1, 1>, scalar_prefetch = 0 : i64, scratch_operands = 1 : i64, tpu.core_type = #tpu.core_type<tc>, window_params = [{transform_indices = @transform_0, window_bounds = array<i64: 16, 64>}, {transform_indices = @transform_1, window_bounds = array<i64: 64, 32>}, {transform_indices = @transform_2, window_bounds = array<i64: 1, 32>}, {transform_indices = @transform_3, window_bounds = array<i64: 16, 32>}]} {
    %c0_i32 = arith.constant 0 : i32
    %0 = arith.cmpi eq, %arg2, %c0_i32 : i32
    %1 = arith.extui %0 : i1 to i32
    %c0_i32_0 = arith.constant 0 : i32
    %2 = arith.cmpi ne, %1, %c0_i32_0 : i32
    scf.if %2 {
      %cst_10 = arith.constant 0.000000e+00 : f32
      %12 = vector.broadcast %cst_10 : f32 to vector<16x32xf32>
      %c0_11 = arith.constant 0 : index
      %c0_12 = arith.constant 0 : index
      %13 = vector.load %arg7[%c0_11, %c0_12] : memref<16x32xf32, #tpu.memory_space<vmem>>, vector<16x32xf32>
      tpu.vector_store %arg7[%c0_11, %c0_12], %12 {strides = array<i32>} : memref<16x32xf32, #tpu.memory_space<vmem>>, vector<16x32xf32>,
    } else {
    }
    %c0 = arith.constant 0 : index
    %c0_1 = arith.constant 0 : index
    %3 = vector.load %arg7[%c0, %c0_1] : memref<16x32xf32, #tpu.memory_space<vmem>>, vector<16x32xf32>
    %c0_2 = arith.constant 0 : index
    %c0_3 = arith.constant 0 : index
    %4 = vector.load %arg3[%c0_2, %c0_3] : memref<16x64xbf16, #tpu.memory_space<vmem>>, vector<16x64xbf16>
    %c0_4 = arith.constant 0 : index
    %c0_5 = arith.constant 0 : index
    %5 = vector.load %arg4[%c0_4, %c0_5] : memref<64x32xbf16, #tpu.memory_space<vmem>>, vector<64x32xbf16>
    %cst = arith.constant dense<0.000000e+00> : vector<16x32xf32>
    %6 = tpu.matmul %4, %5, %cst {dimension_numbers = #tpu.dot_dimension_numbers<[1], [0], [0], [1], [0, 0, 1, 1], [], []>} : vector<16x64xbf16>, vector<64x32xbf16>, vector<16x32xf32> -> vector<16x32xf32>
    %7 = arith.addf %3, %6 : vector<16x32xf32>
    %c0_6 = arith.constant 0 : index
    %c0_7 = arith.constant 0 : index
    %8 = vector.load %arg7[%c0_6, %c0_7] : memref<16x32xf32, #tpu.memory_space<vmem>>, vector<16x32xf32>
    tpu.vector_store %arg7[%c0_6, %c0_7], %7 {strides = array<i32>} : memref<16x32xf32, #tpu.memory_space<vmem>>, vector<16x32xf32>,
    %c0_i32_8 = arith.constant 0 : i32
    %9 = arith.cmpi eq, %arg2, %c0_i32_8 : i32
    %10 = arith.extui %9 : i1 to i32
    %c0_i32_9 = arith.constant 0 : i32
    %11 = arith.cmpi ne, %10, %c0_i32_9 : i32
    scf.if %11 {
      %c0_10 = arith.constant 0 : index
      %c0_11 = arith.constant 0 : index
      %12 = vector.load %arg7[%c0_10, %c0_11] : memref<16x32xf32, #tpu.memory_space<vmem>>, vector<16x32xf32>
      %c0_12 = arith.constant 0 : index
      %c0_13 = arith.constant 0 : index
      %13 = vector.load %arg5[%c0_12, %c0_13] : memref<1x32xf32, #tpu.memory_space<vmem>>, vector<1x32xf32>
      %14 = vector.broadcast %13 : vector<1x32xf32> to vector<16x32xf32>
      %15 = arith.addf %12, %14 : vector<16x32xf32>
      %16 = arith.truncf %15 : vector<16x32xf32> to vector<16x32xbf16>
      %c0_14 = arith.constant 0 : index
      %c0_15 = arith.constant 0 : index
      %17 = vector.load %arg6[%c0_14, %c0_15] : memref<16x32xbf16, #tpu.memory_space<vmem>>, vector<16x32xbf16>
      tpu.vector_store %arg6[%c0_14, %c0_15], %16 {strides = array<i32>} : memref<16x32xbf16, #tpu.memory_space<vmem>>, vector<16x32xbf16>,
    } else {
    }
    return
  }
  func.func @transform_0(%arg0: i32, %arg1: i32, %arg2: i32) -> (i32, i32) {
    %c0_i32 = arith.constant 0 : i32
    return %arg0, %arg2 : i32, i32
  }
  func.func @transform_1(%arg0: i32, %arg1: i32, %arg2: i32) -> (i32, i32) {
    %c0_i32 = arith.constant 0 : i32
    return %arg2, %arg1 : i32, i32
  }
  func.func @transform_2(%arg0: i32, %arg1: i32, %arg2: i32) -> (i32, i32) {
    %c0_i32 = arith.constant 0 : i32
    %c0_i32_0 = arith.constant 0 : i32
    return %c0_i32, %arg1 : i32, i32
  }
  func.func @transform_3(%arg0: i32, %arg1: i32, %arg2: i32) -> (i32, i32) {
    %c0_i32 = arith.constant 0 : i32
    return %arg0, %arg1 : i32, i32
  }
}

module attributes {stable_mosaic.version = 11 : i64} {
  func.func @_attn_kernel(%arg0: i32, %arg1: i32, %arg2: i32, %arg3: memref<1x1x8x8xbf16, #tpu.memory_space<vmem>>, %arg4: memref<1x1x8x8xbf16, #tpu.memory_space<vmem>>, %arg5: memref<1x1x8x8xbf16, #tpu.memory_space<vmem>>, %arg6: memref<1x1x8xf32, #tpu.memory_space<vmem>>, %arg7: memref<1x1x8x8xbf16, #tpu.memory_space<vmem>>, %arg8: memref<1x1x8x8xf32, #tpu.memory_space<vmem>>) attributes {dimension_semantics = [#tpu.dimension_semantics<parallel>, #tpu.dimension_semantics<parallel>, #tpu.dimension_semantics<parallel>], iteration_bounds = array<i64: 2, 4, 1>, scalar_prefetch = 0 : i64, scratch_operands = 0 : i64, tpu.core_type = #tpu.core_type<tc>, window_params = [{transform_indices = @transform_0, window_bounds = array<i64: 1, 1, 8, 8>}, {transform_indices = @transform_1, window_bounds = array<i64: 1, 1, 8, 8>}, {transform_indices = @transform_2, window_bounds = array<i64: 1, 1, 8, 8>}, {transform_indices = @transform_3, window_bounds = array<i64: 1, 1, 8>}, {transform_indices = @transform_4, window_bounds = array<i64: 1, 1, 8, 8>}, {transform_indices = @transform_5, window_bounds = array<i64: 1, 1, 8, 8>}]} {
    %c0 = arith.constant 0 : index
    %c0_0 = arith.constant 0 : index
    %c0_1 = arith.constant 0 : index
    %c0_2 = arith.constant 0 : index
    %0 = vector.load %arg3[%c0, %c0_0, %c0_1, %c0_2] : memref<1x1x8x8xbf16, #tpu.memory_space<vmem>>, vector<1x1x8x8xbf16>
    %1 = vector.shape_cast %0 : vector<1x1x8x8xbf16> to vector<8x8xbf16>
    %c0_3 = arith.constant 0 : index
    %c0_4 = arith.constant 0 : index
    %c0_5 = arith.constant 0 : index
    %c0_6 = arith.constant 0 : index
    %2 = vector.load %arg4[%c0_3, %c0_4, %c0_5, %c0_6] : memref<1x1x8x8xbf16, #tpu.memory_space<vmem>>, vector<1x1x8x8xbf16>
    %3 = vector.shape_cast %2 : vector<1x1x8x8xbf16> to vector<8x8xbf16>
    %c0_7 = arith.constant 0 : index
    %c0_8 = arith.constant 0 : index
    %c0_9 = arith.constant 0 : index
    %c0_10 = arith.constant 0 : index
    %4 = vector.load %arg5[%c0_7, %c0_8, %c0_9, %c0_10] : memref<1x1x8x8xbf16, #tpu.memory_space<vmem>>, vector<1x1x8x8xbf16>
    %5 = vector.shape_cast %4 : vector<1x1x8x8xbf16> to vector<8x8xbf16>
    %cst = arith.constant dense<0.000000e+00> : vector<8x8xf32>
    %6 = tpu.matmul %1, %3, %cst {dimension_numbers = #tpu.dot_dimension_numbers<[1], [1], [0], [0], [0, 0, 1, 0], [], []>} : vector<8x8xbf16>, vector<8x8xbf16>, vector<8x8xf32> -> vector<8x8xf32>
    %cst_11 = arith.constant 0.353553385 : f32
    %7 = vector.broadcast %cst_11 : f32 to vector<8x8xf32>
    %8 = arith.mulf %6, %7 : vector<8x8xf32>
    %c0_12 = arith.constant 0 : index
    %c0_13 = arith.constant 0 : index
    %c0_14 = arith.constant 0 : index
    %9 = vector.load %arg6[%c0_12, %c0_13, %c0_14] : memref<1x1x8xf32, #tpu.memory_space<vmem>>, vector<1x1x8xf32>
    %10 = vector.shape_cast %9 : vector<1x1x8xf32> to vector<1x8xf32>
    %cst_15 = arith.constant 5.000000e-01 : f32
    %11 = vector.broadcast %cst_15 : f32 to vector<1x8xf32>
    %12 = arith.cmpf ogt, %10, %11 : vector<1x8xf32>
    %13 = vector.shape_cast %12 : vector<1x8xi1> to vector<1x8xi1>
    %14 = vector.broadcast %13 : vector<1x8xi1> to vector<8x8xi1>
    %cst_16 = arith.constant -1.000000e+04 : f32
    %15 = vector.broadcast %cst_16 : f32 to vector<8x8xf32>
    %16 = arith.select %14, %8, %15 : vector<8x8xi1>, vector<8x8xf32>
    %cst_17 = arith.constant dense<0xFF800000> : vector<8xf32>
    %17 = vector.multi_reduction <maximumf>, %16, %cst_17 [1] : vector<8x8xf32> to vector<8xf32>
    %18 = vector.shape_cast %17 : vector<8xf32> to vector<8x1xf32>
    %19 = vector.broadcast %18 : vector<8x1xf32> to vector<8x8xf32>
    %20 = arith.subf %16, %19 : vector<8x8xf32>
    %21 = math.exp %20 : vector<8x8xf32>
    %cst_18 = arith.constant dense<0.000000e+00> : vector<8xf32>
    %22 = vector.multi_reduction <add>, %21, %cst_18 [1] : vector<8x8xf32> to vector<8xf32>
    %23 = vector.shape_cast %22 : vector<8xf32> to vector<8x1xf32>
    %24 = vector.broadcast %23 : vector<8x1xf32> to vector<8x8xf32>
    %25 = arith.divf %21, %24 : vector<8x8xf32>
    %c0_19 = arith.constant 0 : index
    %c0_20 = arith.constant 0 : index
    %c0_21 = arith.constant 0 : index
    %c0_22 = arith.constant 0 : index
    %26 = vector.load %arg8[%c0_19, %c0_20, %c0_21, %c0_22] : memref<1x1x8x8xf32, #tpu.memory_space<vmem>>, vector<1x1x8x8xf32>
    %27 = vector.shape_cast %26 : vector<1x1x8x8xf32> to vector<8x8xf32>
    %28 = vector.shape_cast %25 : vector<8x8xf32> to vector<1x1x8x8xf32>
    tpu.vector_store %arg8[%c0_19, %c0_20, %c0_21, %c0_22], %28 {strides = array<i32>} : memref<1x1x8x8xf32, #tpu.memory_space<vmem>>, vector<1x1x8x8xf32>,
    %29 = arith.truncf %25 : vector<8x8xf32> to vector<8x8xbf16>
    %cst_23 = arith.constant dense<0.000000e+00> : vector<8x8xf32>
    %30 = tpu.matmul %29, %5, %cst_23 {dimension_numbers = #tpu.dot_dimension_numbers<[1], [0], [0], [1], [0, 0, 1, 1], [], []>} : vector<8x8xbf16>, vector<8x8xbf16>, vector<8x8xf32> -> vector<8x8xf32>
    %31 = arith.truncf %30 : vector<8x8xf32> to vector<8x8xbf16>
    %c0_24 = arith.constant 0 : index
    %c0_25 = arith.constant 0 : index
    %c0_26 = arith.constant 0 : index
    %c0_27 = arith.constant 0 : index
    %32 = vector.load %arg7[%c0_24, %c0_25, %c0_26, %c0_27] : memref<1x1x8x8xbf16, #tpu.memory_space<vmem>>, vector<1x1x8x8xbf16>
    %33 = vector.shape_cast %32 : vector<1x1x8x8xbf16> to vector<8x8xbf16>
    %34 = vector.shape_cast %31 : vector<8x8xbf16> to vector<1x1x8x8xbf16>
    tpu.vector_store %arg7[%c0_24, %c0_25, %c0_26, %c0_27], %34 {strides = array<i32>} : memref<1x1x8x8xbf16, #tpu.memory_space<vmem>>, vector<1x1x8x8xbf16>,
    return
  }
  func.func @transform_0(%arg0: i32, %arg1: i32, %arg2: i32) -> (i32, i32, i32, i32) {
    %c0_i32 = arith.constant 0 : i32
    %c0_i32_0 = arith.constant 0 : i32
    return %arg0, %arg1, %arg2, %c0_i32 : i32, i32, i32, i32
  }
  func.func @transform_1(%arg0: i32, %arg1: i32, %arg2: i32) -> (i32, i32, i32, i32) {
    %c0_i32 = arith.constant 0 : i32
    %c0_i32_0 = arith.constant 0 : i32
    %c0_i32_1 = arith.constant 0 : i32
    return %arg0, %arg1, %c0_i32, %c0_i32_0 : i32, i32, i32, i32
  }
  func.func @transform_2(%arg0: i32, %arg1: i32, %arg2: i32) -> (i32, i32, i32, i32) {
    %c0_i32 = arith.constant 0 : i32
    %c0_i32_0 = arith.constant 0 : i32
    %c0_i32_1 = arith.constant 0 : i32
    return %arg0, %arg1, %c0_i32, %c0_i32_0 : i32, i32, i32, i32
  }
  func.func @transform_3(%arg0: i32, %arg1: i32, %arg2: i32) -> (i32, i32, i32) {
    %c0_i32 = arith.constant 0 : i32
    %c0_i32_0 = arith.constant 0 : i32
    %c0_i32_1 = arith.constant 0 : i32
    return %arg0, %c0_i32, %c0_i32_0 : i32, i32, i32
  }
  func.func @transform_4(%arg0: i32, %arg1: i32, %arg2: i32) -> (i32, i32, i32, i32) {
    %c0_i32 = arith.constant 0 : i32
    %c0_i32_0 = arith.constant 0 : i32
    return %arg0, %arg1, %arg2, %c0_i32 : i32, i32, i32, i32
  }
  func.func @transform_5(%arg0: i32, %arg1: i32, %arg2: i32) -> (i32, i32, i32, i32) {
    %c0_i32 = arith.constant 0 : i32
    %c0_i32_0 = arith.constant 0 : i32
    return %arg0, %arg1, %arg2, %c0_i32 : i32, i32, i32, i32
  }
}

module attributes {stable_mosaic.version = 11 : i64} {
  func.func @_matmul_kernel(%arg0: i32, %arg1: i32, %arg2: i32, %arg3: memref<16x32xbf16, #tpu.memory_space<vmem>>, %arg4: memref<32x60xbf16, #tpu.memory_space<vmem>>, %arg5: memref<1x60xf32, #tpu.memory_space<vmem>>, %arg6: memref<16x60xf32, #tpu.memory_space<vmem>>, %arg7: memref<16x60xf32, #tpu.memory_space<vmem>>) attributes {dimension_semantics = [#tpu.dimension_semantics<parallel>, #tpu.dimension_semantics<parallel>, #tpu.dimension_semantics<arbitrary>], iteration_bounds = array<i64: 1, 1, 1>, scalar_prefetch = 0 : i64, scratch_operands = 1 : i64, tpu.core_type = #tpu.core_type<tc>, window_params = [{transform_indices = @transform_0, window_bounds = array<i64: 16, 32>}, {transform_indices = @transform_1, window_bounds = array<i64: 32, 60>}, {transform_indices = @transform_2, window_bounds = array<i64: 1, 60>}, {transform_indices = @transform_3, window_bounds = array<i64: 16, 60>}]} {
    %c0_i32 = arith.constant 0 : i32
    %0 = arith.cmpi eq, %arg2, %c0_i32 : i32
    %1 = arith.extui %0 : i1 to i32
    %c0_i32_0 = arith.constant 0 : i32
    %2 = arith.cmpi ne, %1, %c0_i32_0 : i32
    scf.if %2 {
      %cst_10 = arith.constant 0.000000e+00 : f32
      %12 = vector.broadcast %cst_10 : f32 to vector<16x60xf32>
      %c0_11 = arith.constant 0 : index
      %c0_12 = arith.constant 0 : index
      %13 = vector.load %arg7[%c0_11, %c0_12] : memref<16x60xf32, #tpu.memory_space<vmem>>, vector<16x60xf32>
      tpu.vector_store %arg7[%c0_11, %c0_12], %12 {strides = array<i32>} : memref<16x60xf32, #tpu.memory_space<vmem>>, vector<16x60xf32>,
    } else {
    }
    %c0 = arith.constant 0 : index
    %c0_1 = arith.constant 0 : index
    %3 = vector.load %arg7[%c0, %c0_1] : memref<16x60xf32, #tpu.memory_space<vmem>>, vector<16x60xf32>
    %c0_2 = arith.constant 0 : index
    %c0_3 = arith.constant 0 : index
    %4 = vector.load %arg3[%c0_2, %c0_3] : memref<16x32xbf16, #tpu.memory_space<vmem>>, vector<16x32xbf16>
    %c0_4 = arith.constant 0 : index
    %c0_5 = arith.constant 0 : index
    %5 = vector.load %arg4[%c0_4, %c0_5] : memref<32x60xbf16, #tpu.memory_space<vmem>>, vector<32x60xbf16>
    %cst = arith.constant dense<0.000000e+00> : vector<16x60xf32>
    %6 = tpu.matmul %4, %5, %cst {dimension_numbers = #tpu.dot_dimension_numbers<[1], [0], [0], [1], [0, 0, 1, 1], [], []>} : vector<16x32xbf16>, vector<32x60xbf16>, vector<16x60xf32> -> vector<16x60xf32>
    %7 = arith.addf %3, %6 : vector<16x60xf32>
    %c0_6 = arith.constant 0 : index
    %c0_7 = arith.constant 0 : index
    %8 = vector.load %arg7[%c0_6, %c0_7] : memref<16x60xf32, #tpu.memory_space<vmem>>, vector<16x60xf32>
    tpu.vector_store %arg7[%c0_6, %c0_7], %7 {strides = array<i32>} : memref<16x60xf32, #tpu.memory_space<vmem>>, vector<16x60xf32>,
    %c0_i32_8 = arith.constant 0 : i32
    %9 = arith.cmpi eq, %arg2, %c0_i32_8 : i32
    %10 = arith.extui %9 : i1 to i32
    %c0_i32_9 = arith.constant 0 : i32
    %11 = arith.cmpi ne, %10, %c0_i32_9 : i32
    scf.if %11 {
      %c0_10 = arith.constant 0 : index
      %c0_11 = arith.constant 0 : index
      %12 = vector.load %arg7[%c0_10, %c0_11] : memref<16x60xf32, #tpu.memory_space<vmem>>, vector<16x60xf32>
      %c0_12 = arith.constant 0 : index
      %c0_13 = arith.constant 0 : index
      %13 = vector.load %arg5[%c0_12, %c0_13] : memref<1x60xf32, #tpu.memory_space<vmem>>, vector<1x60xf32>
      %14 = vector.broadcast %13 : vector<1x60xf32> to vector<16x60xf32>
      %15 = arith.addf %12, %14 : vector<16x60xf32>
      %c0_14 = arith.constant 0 : index
      %c0_15 = arith.constant 0 : index
      %16 = vector.load %arg6[%c0_14, %c0_15] : memref<16x60xf32, #tpu.memory_space<vmem>>, vector<16x60xf32>
      tpu.vector_store %arg6[%c0_14, %c0_15], %15 {strides = array<i32>} : memref<16x60xf32, #tpu.memory_space<vmem>>, vector<16x60xf32>,
    } else {
    }
    return
  }
  func.func @transform_0(%arg0: i32, %arg1: i32, %arg2: i32) -> (i32, i32) {
    %c0_i32 = arith.constant 0 : i32
    return %arg0, %arg2 : i32, i32
  }
  func.func @transform_1(%arg0: i32, %arg1: i32, %arg2: i32) -> (i32, i32) {
    %c0_i32 = arith.constant 0 : i32
    return %arg2, %arg1 : i32, i32
  }
  func.func @transform_2(%arg0: i32, %arg1: i32, %arg2: i32) -> (i32, i32) {
    %c0_i32 = arith.constant 0 : i32
    %c0_i32_0 = arith.constant 0 : i32
    return %c0_i32, %arg1 : i32, i32
  }
  func.func @transform_3(%arg0: i32, %arg1: i32, %arg2: i32) -> (i32, i32) {
    %c0_i32 = arith.constant 0 : i32
    return %arg0, %arg1 : i32, i32
  }
}

module attributes {stable_mosaic.version = 11 : i64} {
  func.func @_matmul_kernel(%arg0: i32, %arg1: i32, %arg2: i32, %arg3: memref<16x32xbf16, #tpu.memory_space<vmem>>, %arg4: memref<32x64xbf16, #tpu.memory_space<vmem>>, %arg5: memref<1x64xf32, #tpu.memory_space<vmem>>, %arg6: memref<16x64xbf16, #tpu.memory_space<vmem>>, %arg7: memref<16x64xf32, #tpu.memory_space<vmem>>) attributes {dimension_semantics = [#tpu.dimension_semantics<parallel>, #tpu.dimension_semantics<parallel>, #tpu.dimension_semantics<arbitrary>], iteration_bounds = array<i64: 1, 1, 1>, scalar_prefetch = 0 : i64, scratch_operands = 1 : i64, tpu.core_type = #tpu.core_type<tc>, window_params = [{transform_indices = @transform_0, window_bounds = array<i64: 16, 32>}, {transform_indices = @transform_1, window_bounds = array<i64: 32, 64>}, {transform_indices = @transform_2, window_bounds = array<i64: 1, 64>}, {transform_indices = @transform_3, window_bounds = array<i64: 16, 64>}]} {
    %c0_i32 = arith.constant 0 : i32
    %0 = arith.cmpi eq, %arg2, %c0_i32 : i32
    %1 = arith.extui %0 : i1 to i32
    %c0_i32_0 = arith.constant 0 : i32
    %2 = arith.cmpi ne, %1, %c0_i32_0 : i32
    scf.if %2 {
      %cst_10 = arith.constant 0.000000e+00 : f32
      %12 = vector.broadcast %cst_10 : f32 to vector<16x64xf32>
      %c0_11 = arith.constant 0 : index
      %c0_12 = arith.constant 0 : index
      %13 = vector.load %arg7[%c0_11, %c0_12] : memref<16x64xf32, #tpu.memory_space<vmem>>, vector<16x64xf32>
      tpu.vector_store %arg7[%c0_11, %c0_12], %12 {strides = array<i32>} : memref<16x64xf32, #tpu.memory_space<vmem>>, vector<16x64xf32>,
    } else {
    }
    %c0 = arith.constant 0 : index
    %c0_1 = arith.constant 0 : index
    %3 = vector.load %arg7[%c0, %c0_1] : memref<16x64xf32, #tpu.memory_space<vmem>>, vector<16x64xf32>
    %c0_2 = arith.constant 0 : index
    %c0_3 = arith.constant 0 : index
    %4 = vector.load %arg3[%c0_2, %c0_3] : memref<16x32xbf16, #tpu.memory_space<vmem>>, vector<16x32xbf16>
    %c0_4 = arith.constant 0 : index
    %c0_5 = arith.constant 0 : index
    %5 = vector.load %arg4[%c0_4, %c0_5] : memref<32x64xbf16, #tpu.memory_space<vmem>>, vector<32x64xbf16>
    %cst = arith.constant dense<0.000000e+00> : vector<16x64xf32>
    %6 = tpu.matmul %4, %5, %cst {dimension_numbers = #tpu.dot_dimension_numbers<[1], [0], [0], [1], [0, 0, 1, 1], [], []>} : vector<16x32xbf16>, vector<32x64xbf16>, vector<16x64xf32> -> vector<16x64xf32>
    %7 = arith.addf %3, %6 : vector<16x64xf32>
    %c0_6 = arith.constant 0 : index
    %c0_7 = arith.constant 0 : index
    %8 = vector.load %arg7[%c0_6, %c0_7] : memref<16x64xf32, #tpu.memory_space<vmem>>, vector<16x64xf32>
    tpu.vector_store %arg7[%c0_6, %c0_7], %7 {strides = array<i32>} : memref<16x64xf32, #tpu.memory_space<vmem>>, vector<16x64xf32>,
    %c0_i32_8 = arith.constant 0 : i32
    %9 = arith.cmpi eq, %arg2, %c0_i32_8 : i32
    %10 = arith.extui %9 : i1 to i32
    %c0_i32_9 = arith.constant 0 : i32
    %11 = arith.cmpi ne, %10, %c0_i32_9 : i32
    scf.if %11 {
      %c0_10 = arith.constant 0 : index
      %c0_11 = arith.constant 0 : index
      %12 = vector.load %arg7[%c0_10, %c0_11] : memref<16x64xf32, #tpu.memory_space<vmem>>, vector<16x64xf32>
      %c0_12 = arith.constant 0 : index
      %c0_13 = arith.constant 0 : index
      %13 = vector.load %arg5[%c0_12, %c0_13] : memref<1x64xf32, #tpu.memory_space<vmem>>, vector<1x64xf32>
      %14 = vector.broadcast %13 : vector<1x64xf32> to vector<16x64xf32>
      %15 = arith.addf %12, %14 : vector<16x64xf32>
      %cst_14 = arith.constant 0.000000e+00 : f32
      %16 = vector.broadcast %cst_14 : f32 to vector<16x64xf32>
      %17 = arith.maximumf %15, %16 : vector<16x64xf32>
      %18 = arith.truncf %17 : vector<16x64xf32> to vector<16x64xbf16>
      %c0_15 = arith.constant 0 : index
      %c0_16 = arith.constant 0 : index
      %19 = vector.load %arg6[%c0_15, %c0_16] : memref<16x64xbf16, #tpu.memory_space<vmem>>, vector<16x64xbf16>
      tpu.vector_store %arg6[%c0_15, %c0_16], %18 {strides = array<i32>} : memref<16x64xbf16, #tpu.memory_space<vmem>>, vector<16x64xbf16>,
    } else {
    }
    return
  }
  func.func @transform_0(%arg0: i32, %arg1: i32, %arg2: i32) -> (i32, i32) {
    %c0_i32 = arith.constant 0 : i32
    return %arg0, %arg2 : i32, i32
  }
  func.func @transform_1(%arg0: i32, %arg1: i32, %arg2: i32) -> (i32, i32) {
    %c0_i32 = arith.constant 0 : i32
    return %arg2, %arg1 : i32, i32
  }
  func.func @transform_2(%arg0: i32, %arg1: i32, %arg2: i32) -> (i32, i32) {
    %c0_i32 = arith.constant 0 : i32
    %c0_i32_0 = arith.constant 0 : i32
    return %c0_i32, %arg1 : i32, i32
  }
  func.func @transform_3(%arg0: i32, %arg1: i32, %arg2: i32) -> (i32, i32) {
    %c0_i32 = arith.constant 0 : i32
    return %arg0, %arg1 : i32, i32
  }
}

</mosaic_0001>

<bundles_post_ra>
// kernel: _lambda_.52
= control target key start
LH: loop header
LB: loop body
LE: loop exit
PB: predicated region body
PF: predicated region fallthrough
CT: control target
= control target key end

     0   :  { %s672_s15 = smov 0   ;;  %s674_s16 = smov 0   ;;  %s743_s0 = inlined_call_operand.vmem [shape: bf16[2,4,8,8], index: 0, kind: input, shape index: {}]   ;;  %s744_s1 = inlined_call_operand.vmem [shape: bf16[2,4,8,8], index: 1, kind: input, shape index: {}]   ;;  %s745_s2 = inlined_call_operand.vmem [shape: bf16[2,4,8,8], index: 2, kind: input, shape index: {}]   ;;  %s746_s3 = inlined_call_operand.vmem [shape: f32[2,1,8], index: 3, kind: input, shape index: {}]   ;;  %s747_s4 = inlined_call_operand.vmem [shape: bf16[2,4,8,8], index: 4, kind: output, shape index: {}]  }
   0x1   :  { %s676_s17 = smov 0   ;;  %s678_s18 = smov 0  }
   0x2   :  { %s680_s19 = smov 0  }
   0x3 LB: > { %s29_s20 = sadd.s32 1, %s636_s17  ;;  %s33_s21 = sadd.s32 1, %s640_s18  ;;  %s644_s19 = sphi %s680_s19, %s14_s19   ;;  %s640_s18 = sphi %s678_s18, %s751_s18   ;;  %s636_s17 = sphi %s676_s17, %s750_s17   ;;  %s632_s16 = sphi %s674_s16, %s749_s16   ;;  %s628_s15 = sphi %s672_s15, %s748_s15  }
   0x4   : > { %p31_p0 = scmp.ge.s32.totalorder %s29_s20, 4  ;;  %p548_p1 = scmp.ge.s32.totalorder %s644_s19, 1 }
   0x5   : > { %p233_p2 = scmp.lt.s32.totalorder %s644_s19, 9 }
   0x6   : > { %s753_s20 = smov (%p31_p0, %s29_s20), 0  ;;  %s755_s21 = smov (!%p31_p0, %s33_s21), %s640_s18 }
   0x7   : > { %p234_p3 = pnand %p548_p1, %p233_p2  ;;  %p35_p4 = scmp.ge.s32.totalorder %s755_s21, 2 }
   0x8   : > { %p290_p5 = scmp.lt.s32.totalorder (!%p234_p3), %s632_s16, 1  ;;  %p292_p6 = scmp.lt.s32.totalorder (!%p234_p3), %s628_s15, 3 }
   0x9   : > { %s757_s21 = smov (%p35_p4, %s755_s21), 0  ;;  %237 = sbr.rel (%p234_p3) target bundleno = 547 (0x223), region = 36 }
   0xe   : > { %s759_s16 = smov (!%p290_p5, %s632_s16), 1  ;;  %s761_s15 = smov (!%p292_p6, %s628_s15), 3  ;;  %vm335_vm0 = vcmask 64512   ;;  %v646_v4 = vmov 0   ;;  %vm377_vm3 = vcmask 1043456   ;;  %vm395_vm4 = vcmask 60416  }
   0xf   : > { %s549_s22 = sshll.u32 %s759_s16, 2  ;;  %s319_s7 = scalar_lea.vmem %s746_s3, %s759_s16 }
  0x10   : > { %s298_s23 = sadd.s32 %s549_s22, %s761_s15  ;;  %v356_v3 = vld [vmem:[%s319_s7] sm:$0x1] }
  0x11   : > { %s702_s24 = sshll.u32 %s298_s23, 2  ;;  %vm357_vm1 = vcmp.gt.f32.partialorder %v356_v3, 0.5 }
  0x12   : > { %s308_s27 = scalar_lea.vmem %s744_s1, %s702_s24  ;;  %s300_s30 = scalar_lea.vmem %s743_s0, %s702_s24  ;;  %v358_v5 = vsel %vm357_vm1, 1, %v646_v4 }
  0x13   : > { %v333_v0 = vld [vmem:[%s308_s27] sm:$0xf]  ;;  %v359_v6 = vperm.slane %v358_v5, 0  ;;  %s316_s10 = scalar_lea.vmem %s745_s2, %s702_s24  ;;  %s330_s13 = scalar_lea.vmem %s747_s4, %s702_s24 }
  0x14   : > { %v340_v1 = vsel %vm335_vm0, %v333_v0, 0  ;;  %v332_v2 = vld [vmem:[%s300_s30] sm:$0xf] }
  0x15   : > { %349 = vmatpush.bf16.xpose.msra.mxu0 %v340_v1  ;;  %vm360_vm2 = vcmp.eq.s32.totalorder %v359_v6, 1  ;;  %v334_v17 = vld [vmem:[%s316_s10] sm:$0xf] }
  0x16   : > { %v379_v18 = vsel %vm377_vm3, %v334_v17, 0 }
  0x17   : > { %388 = vmatpush.bf16.msra.mxu1 %v379_v18 }
  0x1c   : > { %557 = vmatmul.msk.bf16.vlgmr.msra.gmra.mxu0 %vm335_vm0, %v332_v2 }
  0x99   : > { %v351_v7 = vpop.f32.mrf.mxu0 }
  0x9a   : > { %v355_v8 = vmul.f32 0.35355338, %v351_v7 }
  0x9c   : > { %v361_v9 = vsel %vm360_vm2, %v355_v8, -10000.0 }
  0x9d   : > { %v362_v10 = vsel %vm335_vm0, %v361_v9, -inf }
  0x9e   : > { %363 = vmax.xlane.f32.xlu0 %v362_v10 }
  0xa1   : > { %v353_v11 = vpop.f32.mrf.mxu0 }
 0x111   : > { %v364_v12 = vpop.xlane.xlu0 %363 }
 0x112   : > { %v365_v13 = vsub.f32 %v361_v9, %v364_v12 }
 0x114   : > { %v366_v14 = vmul.f32 1.442695, %v365_v13 }
 0x116   : > { %602 = vpow2.f32 %v366_v14 }
 0x11c   : > { %v603_v15 = vpop.eup %602 }
 0x11d   : > { %v368_v16 = vsel %vm335_vm0, %v603_v15, 0.0 }
 0x11e   : > { %369 = vadd.xlane.f32.xlu0 %v368_v16 }
 0x191   : > { %v370_v19 = vpop.xlane.xlu0 %369 }
 0x192   : > { %604 = vrcp.f32 %v370_v19 }
 0x198   : > { %v605_v20 = vpop.eup %604 }
 0x199   : > { %v372_v21 = vmul.f32 %v605_v20, %v603_v15 }
 0x19b   : > { %v373_v22 = vpack.c.bf16 %v372_v21, %v372_v21 }
 0x19d   : > { %558 = vmatmul.msk.bf16.vlgmr.msra.gmra.mxu1 %vm335_vm0, %v373_v22 }
 0x21a   : > { %v390_v23 = vpop.f32.mrf.mxu1 }
 0x21b   : > { %v394_v24 = vpack.c.bf16 %v390_v23, %v390_v23 }
 0x21d   : > { %396 = vst.msk [vmem:[%s330_s13] sm:$0xf] %vm395_vm4, %v394_v24 }
 0x222   : > { %v392_v25 = vpop.f32.mrf.mxu1 }
 0x223 PF: > { %s14_s19 = sadd.s32 1, %s644_s19   ;;  %s748_s15 = smov %s636_s17 }
 0x224   : > { %p11_p7 = scmp.ge.s32.totalorder %s14_s19, 10   ;;  %s749_s16 = smov %s640_s18 }
 0x225   : > { %s750_s17 = smov %s753_s20  ;;  %s751_s18 = smov %s757_s21 }
 0x226   :  { %13 = sbr.rel (!%p11_p7) target bundleno = 3 (0x3), region = 75 }

// kernel: _lambda_.67
= control target key start
LH: loop header
LB: loop body
LE: loop exit
PB: predicated region body
PF: predicated region fallthrough
CT: control target
= control target key end

     0   :  { %vm19_vm0 = vcmask 261120   ;;  %v107_v1 = vmov 0.0   ;;  %vm82_vm1 = vcmask 257024   ;;  %s151_s1 = inlined_call_operand.vmem [shape: bf16[32,32], index: 1, kind: input, shape index: {}]   ;;  %s152_s2 = inlined_call_operand.vmem [shape: f32[1,32], index: 2, kind: input, shape index: {}]   ;;  %s153_s0 = inlined_call_operand.vmem [shape: bf16[16,32], index: 0, kind: input, shape index: {}]   ;;  %s154_s3 = inlined_call_operand.vmem [shape: bf16[16,32], index: 3, kind: output, shape index: {}]  }
   0x1   :  { %v104_v0 = vld [vmem:[%s151_s1 + $0x8] sm:$0xff]  ;;  %20 = vst.msk [vmem:[#allocation2] sm:$0xff] %vm19_vm0, %v107_v1  ;;  %v103_v2 = vld [vmem:[%s151_s1] sm:$0xff] }
   0x2   :  { %21 = vst.msk [vmem:[#allocation2 + $0x8] sm:$0xff] %vm19_vm0, %v107_v1  ;;  %57 = vmatpush.bf16.msra.mxu0 %v104_v0  ;;  %v102_v3 = vld [vmem:[%s153_s0] sm:$0xff] }
   0x3   :  { %v106_v8 = vld [vmem:[%s152_s2] ss:$0 sm:$0xff] }
   0x6   :  { %58 = vmatpush.bf16.msra.mxu0 %v103_v2 }
   0x8   :  { %v22_v4 = vld [vmem:[#allocation2] sm:$0xff] }
   0x9   :  { %101 = vmatmul.msk.bf16.vlgmr.msra.gmra.mxu0 %vm19_vm0, %v102_v3  ;;  %v23_v7 = vld [vmem:[#allocation2 + $0x8] sm:$0xff] }
  0x86   :  { %v60_v5 = vpop.f32.mrf.mxu0 }
  0x87   :  { %v65_v6 = vadd.f32 %v60_v5, %v22_v4 }
  0x89   :  { %67 = vst.msk [vmem:[#allocation2] sm:$0xff] %vm19_vm0, %v65_v6 }
  0x8e   :  { %v62_v9 = vpop.f32.mrf.mxu0 }
  0x8f   :  { %v66_v10 = vadd.f32 %v62_v9, %v23_v7 }
  0x90   :  { %v72_v11 = vld [vmem:[#allocation2] sm:$0xff] }
  0x91   :  { %v78_v12 = vadd.f32 %v106_v8, %v72_v11  ;;  %68 = vst.msk [vmem:[#allocation2 + $0x8] sm:$0xff] %vm19_vm0, %v66_v10 }
  0x93   :  { %v80_v13 = vpack.c.bf16 %v78_v12, %v78_v12 }
  0x95   :  { %83 = vst.msk [vmem:[%s154_s3] sm:$0xf] %vm82_vm1, %v80_v13 }
  0x98   :  { %v73_v14 = vld [vmem:[#allocation2 + $0x8] sm:$0xff] }
  0x99   :  { %v79_v15 = vadd.f32 %v106_v8, %v73_v14 }
  0x9b   :  { %v81_v16 = vpack.c.bf16 %v79_v15, %v79_v15 }
  0x9d   :  { %84 = vst.msk [vmem:[%s154_s3 + $0x4] sm:$0xf] %vm82_vm1, %v81_v16 }

// kernel: _lambda_.70
= control target key start
LH: loop header
LB: loop body
LE: loop exit
PB: predicated region body
PF: predicated region fallthrough
CT: control target
= control target key end

     0   :  { %s681_s15 = smov 0   ;;  %s683_s16 = smov 0   ;;  %s752_s0 = inlined_call_operand.vmem [shape: bf16[2,4,8,8], index: 0, kind: input, shape index: {}]   ;;  %s753_s1 = inlined_call_operand.vmem [shape: bf16[2,4,8,8], index: 1, kind: input, shape index: {}]   ;;  %s754_s2 = inlined_call_operand.vmem [shape: bf16[2,4,8,8], index: 2, kind: input, shape index: {}]   ;;  %s755_s3 = inlined_call_operand.vmem [shape: f32[2,1,8], index: 3, kind: input, shape index: {}]   ;;  %s756_s4 = inlined_call_operand.vmem [shape: bf16[2,4,8,8], index: 4, kind: output, shape index: {}]  }
   0x1   :  { %s685_s17 = smov 0   ;;  %s687_s18 = smov 0  }
   0x2   :  { %s689_s19 = smov 0  }
   0x3 LB: > { %s29_s20 = sadd.s32 1, %s645_s17  ;;  %s33_s21 = sadd.s32 1, %s649_s18  ;;  %s653_s19 = sphi %s689_s19, %s14_s19   ;;  %s649_s18 = sphi %s687_s18, %s760_s18   ;;  %s645_s17 = sphi %s685_s17, %s759_s17   ;;  %s641_s16 = sphi %s683_s16, %s758_s16   ;;  %s637_s15 = sphi %s681_s15, %s757_s15  }
   0x4   : > { %p31_p0 = scmp.ge.s32.totalorder %s29_s20, 4  ;;  %p557_p1 = scmp.ge.s32.totalorder %s653_s19, 1 }
   0x5   : > { %p233_p2 = scmp.lt.s32.totalorder %s653_s19, 9 }
   0x6   : > { %s762_s20 = smov (%p31_p0, %s29_s20), 0  ;;  %s764_s21 = smov (!%p31_p0, %s33_s21), %s649_s18 }
   0x7   : > { %p234_p3 = pnand %p557_p1, %p233_p2  ;;  %p35_p4 = scmp.ge.s32.totalorder %s764_s21, 2 }
   0x8   : > { %p290_p5 = scmp.lt.s32.totalorder (!%p234_p3), %s641_s16, 1  ;;  %p292_p6 = scmp.lt.s32.totalorder (!%p234_p3), %s637_s15, 3 }
   0x9   : > { %s766_s21 = smov (%p35_p4, %s764_s21), 0  ;;  %237 = sbr.rel (%p234_p3) target bundleno = 547 (0x223), region = 36 }
   0xe   : > { %s768_s16 = smov (!%p290_p5, %s641_s16), 1  ;;  %s770_s15 = smov (!%p292_p6, %s637_s15), 3  ;;  %vm335_vm0 = vcmask 64512   ;;  %v361_v4 = vlaneseq  ;;  %v655_v5 = vmov 0   ;;  %vm386_vm5 = vcmask 1043456  }
   0xf   : > { %s558_s22 = sshll.u32 %s768_s16, 2  ;;  %s319_s7 = scalar_lea.vmem %s755_s3, %s768_s16  ;;  %vm404_vm6 = vcmask 60416  }
  0x10   : > { %s298_s23 = sadd.s32 %s558_s22, %s770_s15  ;;  %v356_v3 = vld [vmem:[%s319_s7] sm:$0x1]  ;;  %v362_v8 = vshrl.u32 %v361_v4, 7  ;;  %v367_v9 = vand.u32 127, %v361_v4 }
  0x11   : > { %s711_s24 = sshll.u32 %s298_s23, 2  ;;  %vm357_vm1 = vcmp.gt.f32.partialorder %v356_v3, 0.5 }
  0x12   : > { %s308_s27 = scalar_lea.vmem %s753_s1, %s711_s24  ;;  %s300_s30 = scalar_lea.vmem %s752_s0, %s711_s24  ;;  %v358_v6 = vsel %vm357_vm1, 1, %v655_v5  ;;  %vm368_vm3 = vcmp.ge.s32.totalorder %v362_v8, %v367_v9 }
  0x13   : > { %v333_v0 = vld [vmem:[%s308_s27] sm:$0xf]  ;;  %v359_v7 = vperm.slane %v358_v6, 0  ;;  %s316_s10 = scalar_lea.vmem %s754_s2, %s711_s24  ;;  %s330_s13 = scalar_lea.vmem %s756_s4, %s711_s24 }
  0x14   : > { %v340_v1 = vsel %vm335_vm0, %v333_v0, 0  ;;  %v332_v2 = vld [vmem:[%s300_s30] sm:$0xf] }
  0x15   : > { %349 = vmatpush.bf16.xpose.msra.mxu0 %v340_v1  ;;  %vm360_vm2 = vcmp.eq.s32.totalorder %v359_v7, 1  ;;  %v334_v20 = vld [vmem:[%s316_s10] sm:$0xf] }
  0x16   : > { %vm369_vm4 = vmand %vm360_vm2, %vm368_vm3  ;;  %v388_v21 = vsel %vm386_vm5, %v334_v20, 0 }
  0x17   : > { %397 = vmatpush.bf16.msra.mxu1 %v388_v21 }
  0x1c   : > { %566 = vmatmul.msk.bf16.vlgmr.msra.gmra.mxu0 %vm335_vm0, %v332_v2 }
  0x99   : > { %v351_v10 = vpop.f32.mrf.mxu0 }
  0x9a   : > { %v355_v11 = vmul.f32 0.35355338, %v351_v10 }
  0x9c   : > { %v370_v12 = vsel %vm369_vm4, %v355_v11, -10000.0 }
  0x9d   : > { %v371_v13 = vsel %vm335_vm0, %v370_v12, -inf }
  0x9e   : > { %372 = vmax.xlane.f32.xlu0 %v371_v13 }
  0xa1   : > { %v353_v14 = vpop.f32.mrf.mxu0 }
 0x111   : > { %v373_v15 = vpop.xlane.xlu0 %372 }
 0x112   : > { %v374_v16 = vsub.f32 %v370_v12, %v373_v15 }
 0x114   : > { %v375_v17 = vmul.f32 1.442695, %v374_v16 }
 0x116   : > { %611 = vpow2.f32 %v375_v17 }
 0x11c   : > { %v612_v18 = vpop.eup %611 }
 0x11d   : > { %v377_v19 = vsel %vm335_vm0, %v612_v18, 0.0 }
 0x11e   : > { %378 = vadd.xlane.f32.xlu0 %v377_v19 }
 0x191   : > { %v379_v22 = vpop.xlane.xlu0 %378 }
 0x192   : > { %613 = vrcp.f32 %v379_v22 }
 0x198   : > { %v614_v23 = vpop.eup %613 }
 0x199   : > { %v381_v24 = vmul.f32 %v614_v23, %v612_v18 }
 0x19b   : > { %v382_v25 = vpack.c.bf16 %v381_v24, %v381_v24 }
 0x19d   : > { %567 = vmatmul.msk.bf16.vlgmr.msra.gmra.mxu1 %vm335_vm0, %v382_v25 }
 0x21a   : > { %v399_v26 = vpop.f32.mrf.mxu1 }
 0x21b   : > { %v403_v27 = vpack.c.bf16 %v399_v26, %v399_v26 }
 0x21d   : > { %405 = vst.msk [vmem:[%s330_s13] sm:$0xf] %vm404_vm6, %v403_v27 }
 0x222   : > { %v401_v28 = vpop.f32.mrf.mxu1 }
 0x223 PF: > { %s14_s19 = sadd.s32 1, %s653_s19   ;;  %s757_s15 = smov %s645_s17 }
 0x224   : > { %p11_p7 = scmp.ge.s32.totalorder %s14_s19, 10   ;;  %s758_s16 = smov %s649_s18 }
 0x225   : > { %s759_s17 = smov %s762_s20  ;;  %s760_s18 = smov %s766_s21 }
 0x226   :  { %13 = sbr.rel (!%p11_p7) target bundleno = 3 (0x3), region = 75 }

// kernel: _lambda_.72
= control target key start
LH: loop header
LB: loop body
LE: loop exit
PB: predicated region body
PF: predicated region fallthrough
CT: control target
= control target key end

     0   :  { %vm27_vm0 = vcmask 261120   ;;  %v121_v14 = vmov 32.0   ;;  %vm97_vm6 = vcmask 257024   ;;  %s171_s0 = inlined_call_operand.vmem [shape: bf16[16,32], index: 0, kind: input, shape index: {}]   ;;  %s172_s1 = inlined_call_operand.vmem [shape: bf16[16,32], index: 1, kind: input, shape index: {}]   ;;  %s173_s2 = inlined_call_operand.vmem [shape: f32[1,32], index: 2, kind: input, shape index: {}]   ;;  %s174_s3 = inlined_call_operand.vmem [shape: f32[1,32], index: 3, kind: input, shape index: {}]   ;;  %s175_s4 = inlined_call_operand.vmem [shape: bf16[16,32], index: 4, kind: output, shape index: {}]  }
   0x1   :  { %v105_v0 = vld [vmem:[%s171_s0] sm:$0xff]   ;;  %115 = vrcp.f32 %v121_v14 }
   0x2   :  { %v109_v1 = vld [vmem:[%s172_s1] sm:$0xff]   ;;  %v106_v2 = vunpack.c.l.bf16 %v105_v0  ;;  %v107_v4 = vunpack.c.h.bf16 %v105_v0 }
   0x3   :  { %v110_v3 = vunpack.c.l.bf16 %v109_v1  ;;  %v111_v5 = vunpack.c.h.bf16 %v109_v1  ;;  %v113_v44 = vld [vmem:[%s173_s2] ss:$0 sm:$0xff] }
   0x4   :  { %v114_v47 = vld [vmem:[%s174_s3] ss:$0 sm:$0xff] }
   0x5   :  { %v25_v6 = vadd.f32 %v110_v3, %v106_v2  ;;  %v153_v9 = vadd.f32 %v111_v5, %v107_v4 }
   0x7   :  { %v28_v7 = vsel %vm27_vm0, %v25_v6, 0.0  ;;  %v43_v8 = vmul.f32 %v25_v6, %v25_v6  ;;  %v44_v11 = vmul.f32 %v153_v9, %v153_v9  ;;  %v31_v12 = vsel %vm27_vm0, %v153_v9, 0.0  ;;  %v116_v15 = vpop.eup %115 }
   0x8   :  { %29 = vadd.xlane.f32.xlu0 %v28_v7  ;;  %v35_v16 = vmul.f32 32.0, %v116_v15  ;;  %vm39_vm1 = vweird.f32 %v116_v15 }
   0x9   :  { %v45_v10 = vsel %vm27_vm0, %v43_v8, 0.0  ;;  %v48_v13 = vsel %vm27_vm0, %v44_v11, 0.0 }
   0xa   :  { %46 = vadd.xlane.f32.xlu1 %v45_v10  ;;  %v36_v17 = vsub.f32 1.0, %v35_v16 }
   0xc   :  { %v37_v18 = vmul.f32 %v116_v15, %v36_v17 }
   0xe   :  { %v38_v19 = vadd.f32 %v116_v15, %v37_v18 }
  0x10   :  { %32 = vadd.xlane.f32.xlu0 %v31_v12  ;;  %v40_v20 = vsel %vm39_vm1, %v116_v15, %v38_v19 }
  0x12   :  { %49 = vadd.xlane.f32.xlu1 %v48_v13 }
  0x7b   :  { %v30_v21 = vpop.xlane.xlu0 %29 }
  0x7c   :  { %v41_v22 = vmul.f32 %v40_v20, %v30_v21 }
  0x7d   :  { %v47_v23 = vpop.xlane.xlu1 %46 }
  0x7e   :  { %v53_v24 = vmul.f32 %v41_v22, %v41_v22  ;;  %v51_v25 = vmul.f32 %v47_v23, %v40_v20  ;;  %v57_v43 = vsub.f32 %v25_v6, %v41_v22 }
  0x80   :  { %v55_v26 = vsub.f32 %v51_v25, %v53_v24 }
  0x82   :  { %v59_v27 = vadd.f32 1e-05, %v55_v26 }
  0x83   :  { %v33_v28 = vpop.xlane.xlu0 %32 }
  0x84   :  { %117 = vrsqrt.f32 %v59_v27  ;;  %v42_v29 = vmul.f32 %v40_v20, %v33_v28  ;;  %vm67_vm3 = vweird.f32 %v59_v27 }
  0x85   :  { %v50_v30 = vpop.xlane.xlu1 %49 }
  0x86   :  { %v54_v31 = vmul.f32 %v42_v29, %v42_v29  ;;  %v52_v32 = vmul.f32 %v50_v30, %v40_v20  ;;  %v58_v55 = vsub.f32 %v153_v9, %v42_v29 }
  0x88   :  { %v56_v33 = vsub.f32 %v52_v32, %v54_v31 }
  0x8a   :  { %v118_v34 = vpop.eup %117  ;;  %v60_v35 = vadd.f32 1e-05, %v56_v33 }
  0x8b   :  { %v62_v36 = vmul.f32 %v118_v34, %v59_v27  ;;  %vm68_vm2 = vweird.f32 %v118_v34 }
  0x8c   :  { %119 = vrsqrt.f32 %v60_v35  ;;  %vm69_vm4 = vmor %vm67_vm3, %vm68_vm2  ;;  %vm77_vm7 = vweird.f32 %v60_v35 }
  0x8d   :  { %v63_v37 = vmul.f32 %v118_v34, %v62_v36 }
  0x8f   :  { %v64_v38 = vmul.f32 0.5, %v63_v37 }
  0x91   :  { %v65_v39 = vsub.f32 1.5, %v64_v38 }
  0x92   :  { %v120_v40 = vpop.eup %119 }
  0x93   :  { %v66_v41 = vmul.f32 %v118_v34, %v65_v39  ;;  %v72_v42 = vmul.f32 %v120_v40, %v60_v35  ;;  %vm78_vm5 = vweird.f32 %v120_v40 }
  0x94   :  { %vm79_vm8 = vmor %vm77_vm7, %vm78_vm5 }
  0x95   :  { %v70_v45 = vsel %vm69_vm4, %v118_v34, %v66_v41  ;;  %v73_v46 = vmul.f32 %v120_v40, %v72_v42 }
  0x96   :  { %v81_v48 = vmul.f32 %v70_v45, %v57_v43 }
  0x97   :  { %v74_v49 = vmul.f32 0.5, %v73_v46 }
  0x98   :  { %v87_v50 = vmul.f32 %v113_v44, %v81_v48 }
  0x99   :  { %v75_v51 = vsub.f32 1.5, %v74_v49 }
  0x9a   :  { %v93_v52 = vadd.f32 %v114_v47, %v87_v50 }
  0x9b   :  { %v76_v53 = vmul.f32 %v120_v40, %v75_v51 }
  0x9c   :  { %v95_v54 = vpack.c.bf16 %v93_v52, %v93_v52 }
  0x9d   :  { %v80_v56 = vsel %vm79_vm8, %v120_v40, %v76_v53 }
  0x9e   :  { %98 = vst.msk [vmem:[%s175_s4] sm:$0xf] %vm97_vm6, %v95_v54  ;;  %v82_v57 = vmul.f32 %v80_v56, %v58_v55 }
  0xa0   :  { %v88_v58 = vmul.f32 %v113_v44, %v82_v57 }
  0xa2   :  { %v94_v59 = vadd.f32 %v114_v47, %v88_v58 }
  0xa4   :  { %v96_v60 = vpack.c.bf16 %v94_v59, %v94_v59 }
  0xa6   :  { %99 = vst.msk [vmem:[%s175_s4 + $0x4] sm:$0xf] %vm97_vm6, %v96_v60 }

// kernel: _lambda_.56
= control target key start
LH: loop header
LB: loop body
LE: loop exit
PB: predicated region body
PF: predicated region fallthrough
CT: control target
= control target key end

     0   :  { %vm19_vm0 = vcmask 261120   ;;  %v134_v1 = vmov 0.0   ;;  %vm63_vm1 = vcmask 523264   ;;  %vm99_vm2 = vcmask 257024   ;;  %s183_s1 = inlined_call_operand.vmem [shape: bf16[64,32], index: 1, kind: input, shape index: {}]   ;;  %s184_s2 = inlined_call_operand.vmem [shape: f32[1,32], index: 2, kind: input, shape index: {}]   ;;  %s185_s0 = inlined_call_operand.vmem [shape: bf16[16,64], index: 0, kind: input, shape index: {}]   ;;  %s186_s3 = inlined_call_operand.vmem [shape: bf16[16,32], index: 3, kind: output, shape index: {}]  }
   0x1   :  { %v131_v0 = vld [vmem:[%s183_s1 + $0x18] sm:$0xff]  ;;  %20 = vst.msk [vmem:[#allocation2] sm:$0xff] %vm19_vm0, %v134_v1  ;;  %v130_v2 = vld [vmem:[%s183_s1 + $0x10] sm:$0xff]  ;;  %v129_v3 = vld [vmem:[%s183_s1 + $0x8] sm:$0xff] }
   0x2   :  { %21 = vst.msk [vmem:[#allocation2 + $0x8] sm:$0xff] %vm19_vm0, %v134_v1  ;;  %71 = vmatpush.bf16.msra.mxu0 %v131_v0  ;;  %v128_v4 = vld [vmem:[%s183_s1] sm:$0xff] }
   0x3   :  { %v127_v5 = vld [vmem:[%s185_s0] sm:$0xff] }
   0x4   :  { %v133_v10 = vld [vmem:[%s184_s2] ss:$0 sm:$0xff] }
   0x6   :  { %72 = vmatpush.bf16.msra.mxu0 %v130_v2 }
   0x8   :  { %v22_v6 = vld [vmem:[#allocation2] sm:$0xff] }
   0x9   :  { %v23_v9 = vld [vmem:[#allocation2 + $0x8] sm:$0xff] }
   0xa   :  { %73 = vmatpush.bf16.msra.mxu0 %v129_v3 }
   0xe   :  { %74 = vmatpush.bf16.msra.mxu0 %v128_v4 }
  0x11   :  { %126 = vmatmul.msk.bf16.vlgmr.msra.gmra.mxu0 %vm63_vm1, %v127_v5 }
  0x8e   :  { %v76_v7 = vpop.f32.mrf.mxu0 }
  0x8f   :  { %v81_v8 = vadd.f32 %v76_v7, %v22_v6 }
  0x91   :  { %84 = vst.msk [vmem:[#allocation2] sm:$0xff] %vm19_vm0, %v81_v8 }
  0x96   :  { %v78_v11 = vpop.f32.mrf.mxu0 }
  0x97   :  { %v82_v12 = vadd.f32 %v78_v11, %v23_v9 }
  0x98   :  { %v89_v13 = vld [vmem:[#allocation2] sm:$0xff] }
  0x99   :  { %v95_v14 = vadd.f32 %v133_v10, %v89_v13  ;;  %85 = vst.msk [vmem:[#allocation2 + $0x8] sm:$0xff] %vm19_vm0, %v82_v12 }
  0x9b   :  { %v97_v15 = vpack.c.bf16 %v95_v14, %v95_v14 }
  0x9d   :  { %100 = vst.msk [vmem:[%s186_s3] sm:$0xf] %vm99_vm2, %v97_v15 }
  0xa0   :  { %v90_v16 = vld [vmem:[#allocation2 + $0x8] sm:$0xff] }
  0xa1   :  { %v96_v17 = vadd.f32 %v133_v10, %v90_v16 }
  0xa3   :  { %v98_v18 = vpack.c.bf16 %v96_v17, %v96_v17 }
  0xa5   :  { %101 = vst.msk [vmem:[%s186_s3 + $0x4] sm:$0xf] %vm99_vm2, %v98_v18 }

// kernel: _lambda_.91
= control target key start
LH: loop header
LB: loop body
LE: loop exit
PB: predicated region body
PF: predicated region fallthrough
CT: control target
= control target key end

     0   :  { %s1029_s0 = inlined_call_operand.vmem [shape: bf16[2,4,8,8], index: 0, kind: input, shape index: {}]   ;;  %s1030_s1 = inlined_call_operand.vmem [shape: bf16[2,4,8,8], index: 1, kind: input, shape index: {}]   ;;  %s1031_s2 = inlined_call_operand.vmem [shape: bf16[2,4,8,8], index: 2, kind: input, shape index: {}]   ;;  %s1032_s3 = inlined_call_operand.vmem [shape: f32[2,1,8], index: 3, kind: input, shape index: {}]   ;;  %s1033_s4 = inlined_call_operand.vmem [shape: bf16[2,4,8,8], index: 4, kind: output, shape index: {0}]   ;;  %s1034_s5 = inlined_call_operand.hbm [shape: f32[2,4,8,8], index: 5, kind: output, shape index: {1}]  }
   0x1   :  { %1035 = sst [smem:[#allocation5_spill]] %s1029_s0 }
   0x2   :  { %1036 = sst [smem:[#allocation6_spill]] %s1030_s1 }
   0x3   :  { %1037 = sst [smem:[#allocation7_spill]] %s1031_s2 }
   0x4   :  { %11 = vsyncpa [#allocation3], 0 }
   0x5   :  { %13 = vsyncpa [#allocation3 + $0x1], 0  ;;  %s883_s18 = smov 0   ;;  %s885_s19 = smov 0  }
   0x6   :  { %s887_s20 = smov 0   ;;  %s889_s21 = smov 0  }
   0x7   :  { %s891_s22 = smov 0   ;;  %s893_s23 = smov 0  }
   0x8   :  { %s895_s24 = smov 0   ;;  %s897_s25 = smov 0  }
   0x9 LB: > { %s659_s26 = sadd.s32 4294967295, %s850_s25   ;;  %s660_s27 = sadd.s32 4294967294, %s850_s25   ;;  %s850_s25 = sphi %s897_s25, %s19_s25   ;;  %s846_s24 = sphi %s895_s24, %s1049_s24   ;;  %s842_s23 = sphi %s893_s23, %s1048_s23   ;;  %s838_s22 = sphi %s891_s22, %s1047_s22   ;;  %s834_s21 = sphi %s889_s21, %s1046_s21   ;;  %s830_s20 = sphi %s887_s20, %s1045_s20   ;;  %s826_s19 = sphi %s885_s19, %s1044_s19   ;;  %s822_s18 = sphi %s883_s18, %s1043_s18  }
   0xa   : > { %s34_s28 = sadd.s32 1, %s842_s23  ;;  %s38_s29 = sadd.s32 1, %s846_s24 }
   0xb   : > { %p36_p0 = scmp.ge.s32.totalorder %s34_s28, 4  ;;  %p201_p1 = scmp.ne.s32.totalorder %s830_s20, %s826_s19 }
   0xc   : > { %p202_p2 = scmp.eq.s32.totalorder %s659_s26, 7  ;;  %p207_p5 = scmp.ne.s32.totalorder %s826_s19, %s822_s18 }
   0xd   : > { %s1051_s28 = smov (%p36_p0, %s34_s28), 0  ;;  %s1053_s29 = smov (!%p36_p0, %s38_s29), %s846_s24 }
   0xe   : > { %s185_s30 = ssub.s32 %s842_s23, %s1051_s28  ;;  %p934_p3 = por %p202_p2, %p201_p1 }
   0xf   : > { %p40_p4 = scmp.ge.s32.totalorder %s1053_s29, 2  ;;  %p208_p6 = scmp.eq.s32.totalorder %s660_s27, 7 }
  0x10   : > { %p663_p7 = scmp.ge.s32.totalorder %s850_s25, 1  ;;  %p268_p9 = scmp.lt.s32.totalorder %s850_s25, 9 }
  0x11   : > { %s1055_s29 = smov (%p40_p4, %s1053_s29), 0  ;;  %p943_p8 = por %p208_p6, %p207_p5 }
  0x12   : > { %s184_s8 = ssub.s32 %s846_s24, %s1055_s29  ;;  %s191_s9 = sadd.s32 1, %s830_s20 }
  0x13   : > { %s186_s10 = sor.u32 %s185_s30, %s184_s8  ;;  %p269_p10 = pnand %p663_p7, %p268_p9 }
  0x14   : > { %p189_p11 = scmp.eq.s32.totalorder %s186_s10, 0  ;;  %p332_p12 = scmp.lt.s32.totalorder (!%p269_p10), %s838_s22, 1 }
  0x15   : > { %272 = sbr.rel (%p269_p10) target bundleno = 570 (0x23a), region = 36  ;;  %p334_p13 = scmp.lt.s32.totalorder (!%p269_p10), %s834_s21, 3 }
  0x16   : > { %s952_s11 = scalar_select %p189_p11, %s830_s20, %s191_s9  }
  0x17   : > { %s1040_s1 = sld [smem:[#allocation6_spill]] (!%p269_p10)  ;;  %s329_s26 = sand.u32 (!%p269_p10), 1, %s826_s19  }
  0x18   : > { %s1041_s0 = sld [smem:[#allocation5_spill]] (!%p269_p10)  ;;  %s676_s8 = sshll.u32 (!%p269_p10), %s838_s22, 2 }
  0x19   : > { %s1042_s2 = sld [smem:[#allocation7_spill]] (!%p269_p10) }
  0x1a   : > { %s333_s12 = scalar_select %p332_p12, %s838_s22, 1  ;;  %vm377_vm0 = vcmask 64512   ;;  %v852_v4 = vmov 0   ;;  %vm433_vm3 = vcmask 1043456  }
  0x1b   : > { %s335_s13 = scalar_select %p334_p13, %s834_s21, 3 }
  0x1c   : > { %s665_s14 = sshll.u32 %s333_s12, 2 }
  0x1d   : > { %s340_s15 = sadd.s32 %s665_s14, %s335_s13  ;;  %s361_s14 = scalar_lea.vmem %s1032_s3, %s333_s12 }
  0x1e   : > { %s958_s16 = sshll.u32 %s340_s15, 2  ;;  %v398_v3 = vld [vmem:[%s361_s14] sm:$0x1] }
  0x1f   : > { %s350_s27 = scalar_lea.vmem %s1040_s1, %s958_s16  ;;  %s342_s9 = scalar_lea.vmem %s1041_s0, %s958_s16  ;;  %vm399_vm1 = vcmp.gt.f32.partialorder %v398_v3, 0.5 }
  0x20   : > { %v375_v0 = vld [vmem:[%s350_s27] sm:$0xf]  ;;  %v400_v5 = vsel %vm399_vm1, 1, %v852_v4  ;;  %s358_s17 = scalar_lea.vmem %s1042_s2, %s958_s16  ;;  %s664_s27 = sshll.u32 %s329_s26, 3 }
  0x21   : > { %v382_v1 = vsel %vm377_vm0, %v375_v0, 0  ;;  %v374_v2 = vld [vmem:[%s342_s9] sm:$0xf]  ;;  %v401_v6 = vperm.slane %v400_v5, 0  ;;  %s331_s30 = scalar_lea.vmem [#allocation2], %s664_s27  ;;  %s479_s9 = sadd.s32 %s834_s21, %s676_s8 }
  0x22   : > { %391 = vmatpush.bf16.xpose.msra.mxu0 %v382_v1  ;;  %v376_v17 = vld [vmem:[%s358_s17] sm:$0xf]  ;;  %s677_s10 = sshll.u32 %s479_s9, 3  ;;  %s483_s15 = sshll.u32 %s331_s30, 4  ;;  %s484_s15 = int_to_ptr.vmem [resolvable:$true] %s483_s15 }
  0x23   : > { %vm402_vm2 = vcmp.eq.s32.totalorder %v401_v6, 1  ;;  %v435_v18 = vsel %vm433_vm3, %v376_v17, 0  ;;  %s481_s12 = scalar_lea.hbm %s1034_s5, %s677_s10  ;;  %s465_s0 = scalar_lea.sflag [#allocation3], %s329_s26 }
  0x24   : > { %444 = vmatpush.bf16.msra.mxu1 %v435_v18  ;;  %s485_s17 = sshll.u32 %s481_s12, 4  ;;  %s776_s21 = scalar_lea.hbm %s1034_s5, 64  ;;  %s486_s17 = int_to_ptr.hbm [resolvable:$true] %s485_s17 }
  0x25   : > { %s770_s1 = sshra.s32 %s486_s17, 4  ;;  %s771_s1 = int_to_ptr.hbm [resolvable:$true] %s770_s1 }
  0x26   : > { %s772_s27 = scalar_lea.hbm %s771_s1, 8  ;;  %p777_p4 = scmp.lt.s32.totalorder %s771_s1, %s1034_s5 }
  0x27   : > { %p773_p0 = scmp.ne.s32.totalorder %s771_s1, %s772_s27  ;;  %p778_p5 = scmp.lt.s32.totalorder %s776_s21, %s772_s27 }
  0x29   : > { %673 = vmatmul.msk.bf16.vlgmr.msra.gmra.mxu0 %vm377_vm0, %v374_v2  ;;  %p774_p1 = pnand %p773_p0, %p934_p3  ;;  %p779_p6 = por %p778_p5, %p777_p4 }
  0x2b   : > { %p775_p2 = pneg %p774_p1 }
  0x2d   : > { %p780_p7 = pnand %p779_p6, %p775_p2 }
  0xa6   : > { %v393_v7 = vpop.f32.mrf.mxu0 }
  0xa7   : > { %v397_v8 = vmul.f32 0.35355338, %v393_v7 }
  0xa9   : > { %v403_v9 = vsel %vm402_vm2, %v397_v8, -10000.0 }
  0xaa   : > { %v404_v10 = vsel %vm377_vm0, %v403_v9, -inf }
  0xab   : > { %405 = vmax.xlane.f32.xlu0 %v404_v10 }
  0xae   : > { %v395_v11 = vpop.f32.mrf.mxu0 }
 0x11e   : > { %v406_v12 = vpop.xlane.xlu0 %405 }
 0x11f   : > { %v407_v13 = vsub.f32 %v403_v9, %v406_v12 }
 0x121   : > { %v408_v14 = vmul.f32 1.442695, %v407_v13 }
 0x123   : > { %752 = vpow2.f32 %v408_v14 }
 0x129   : > { %v753_v15 = vpop.eup %752 }
 0x12a   : > { %v410_v16 = vsel %vm377_vm0, %v753_v15, 0.0 }
 0x12b   : > { %411 = vadd.xlane.f32.xlu0 %v410_v16 }
 0x19e   : > { %v412_v19 = vpop.xlane.xlu0 %411 }
 0x19f   : > { %754 = vrcp.f32 %v412_v19  ;;  %v424_v23 = vand.u32 2147483648, %v412_v19  ;;  %v422_v25 = vand.u32 2147483647, %v412_v19  ;;  %vm418_vm5 = vweird.f32 %v412_v19 }
 0x1a1   : > { %v425_v27 = vor.u32 1.1754944e-38, %v424_v23  ;;  %vm423_vm7 = vcmp.eq.f32.partialorder %v422_v25, 8.507059e+37 }
 0x1a5   : > { %v755_v20 = vpop.eup %754 }
 0x1a6   : > { %v414_v21 = vmul.f32 %v755_v20, %v412_v19  ;;  %vm419_vm4 = vweird.f32 %v755_v20 }
 0x1a7   : > { %vm420_vm6 = vmor %vm418_vm5, %vm419_vm4 }
 0x1a8   : > { %v415_v22 = vsub.f32 1.0, %v414_v21 }
 0x1aa   : > { %v416_v24 = vmul.f32 %v755_v20, %v415_v22 }
 0x1ac   : > { %v417_v26 = vadd.f32 %v755_v20, %v416_v24 }
 0x1ae   : > { %v421_v28 = vsel %vm420_vm6, %v755_v20, %v417_v26 }
 0x1af   : > { %v426_v29 = vsel %vm423_vm7, %v425_v27, %v421_v28 }
 0x1b0   : > { %v427_v30 = vmul.f32 %v753_v15, %v426_v29 }
 0x1b2   : > { %v429_v31 = vpack.c.bf16 %v427_v30, %v427_v30  ;;  %428 = vst.msk [vmem:[%s331_s30] sm:$0xff] %vm377_vm0, %v427_v30 }
 0x1b4   : > { %674 = vmatmul.msk.bf16.vlgmr.msra.gmra.mxu1 %vm377_vm0, %v429_v31 }
 0x1b5   : > { %783 = shalt.err (!%p780_p7)
}
 0x1b6   : > { %680 = dma.vmem_to_hbm [thread:$0]  (%p934_p3), %s484_s15, 128, %s486_s17, %s465_s0   ;;  %vm451_vm8 = vcmask 60416  }
 0x1b7   : > { %s372_s10 = scalar_lea.vmem %s1033_s4, %s958_s16 }
 0x231   : > { %v446_v32 = vpop.f32.mrf.mxu1 }
 0x232   : > { %v450_v33 = vpack.c.bf16 %v446_v32, %v446_v32 }
 0x234   : > { %452 = vst.msk [vmem:[%s372_s10] sm:$0xf] %vm451_vm8, %v450_v33 }
 0x239   : > { %v448_v34 = vpop.f32.mrf.mxu1 }
 0x23a PF: > { %p686_p9 = scmp.ge.s32.totalorder %s850_s25, 2  ;;  %s511_s1 = sand.u32 1, %s822_s18  }
 0x23b   : > { %s512_s2 = scalar_lea.sflag [#allocation3], %s511_s1 }
 0x23c   : > { %p683_p10 = pnand %p686_p9, %p943_p8 }
 0x23e   : > { %p684_p11 = pneg %p683_p10 }
 0x240   : > { %817 = dma.done.wait (%p684_p11), %s512_s2, 128  }
 0x241   : > { %819 = vsyncadd (%p684_p11), %s512_s2, 4294967168  ;;  %s19_s25 = sadd.s32 1, %s850_s25   ;;  %s1043_s18 = smov %s826_s19 }
 0x242   : > { %p16_p3 = scmp.ge.s32.totalorder %s19_s25, 10   ;;  %s1044_s19 = smov %s830_s20 }
 0x243   : > { %s1045_s20 = smov %s952_s11  ;;  %s1046_s21 = smov %s842_s23 }
 0x244   : > { %s1047_s22 = smov %s846_s24  ;;  %s1048_s23 = smov %s1051_s28 }
 0x245   : > { %s1049_s24 = smov %s1055_s29  ;;  %18 = sbr.rel (!%p16_p3) target bundleno = 9 (0x9), region = 92 }
 0x24a   :  { %518 = vsyncpa [#allocation3], 1 }
 0x24b   :  { %520 = vsyncpa [#allocation3 + $0x1], 1 }

// kernel: _lambda_.97
= control target key start
LH: loop header
LB: loop body
LE: loop exit
PB: predicated region body
PF: predicated region fallthrough
CT: control target
= control target key end

     0   :  { %vm20_vm0 = vcmask 490496   ;;  %v149_v1 = vmov 0.0   ;;  %s194_s0 = inlined_call_operand.vmem [shape: bf16[16,32], index: 0, kind: input, shape index: {}]   ;;  %s195_s1 = inlined_call_operand.vmem [shape: bf16[32,60], index: 1, kind: input, shape index: {}]   ;;  %s196_s2 = inlined_call_operand.vmem [shape: f32[1,60], index: 2, kind: input, shape index: {}]   ;;  %s197_s3 = inlined_call_operand.hbm [shape: f32[16,60], index: 3, kind: output, shape index: {}]  }
   0x1   :  { %v117_v0 = vld [vmem:[%s195_s1 + $0x8] sm:$0xff]  ;;  %21 = vst.msk [vmem:[#allocation2] sm:$0xff] %vm20_vm0, %v149_v1 }
   0x2   :  { %8 = vsyncpa [#allocation4], 0  ;;  %58 = vmatpush.bf16.msra.mxu0 %v117_v0  ;;  %v116_v2 = vld [vmem:[%s195_s1] sm:$0xff]  ;;  %22 = vst.msk [vmem:[#allocation2 + $0x8] sm:$0xff] %vm20_vm0, %v149_v1  ;;  %vm48_vm1 = vcmask 261120   ;;  %s90_s22 = sshll.u32 %s197_s3, 4  ;;  %s91_s22 = int_to_ptr.hbm [resolvable:$true] %s90_s22 }
   0x3   :  { %v115_v3 = vld [vmem:[%s194_s0] sm:$0xff]  ;;  %s150_s0 = smov [#allocation3]   ;;  %s152_s23 = smov 8  }
   0x4   :  { %v122_v8 = vld [vmem:[%s196_s2] ss:$0 sm:$0xff]  ;;  %s88_s1 = sshll.u32 %s150_s0, 4  ;;  %s151_s2 = smov 128   ;;  %s89_s1 = int_to_ptr.vmem [resolvable:$true] %s88_s1 }
   0x6   :  { %59 = vmatpush.bf16.msra.mxu0 %v116_v2 }
   0x8   :  { %v23_v4 = vld [vmem:[#allocation2] sm:$0xff] }
   0x9   :  { %114 = vmatmul.msk.bf16.vlgmr.msra.gmra.mxu0 %vm48_vm1, %v115_v3  ;;  %v24_v7 = vld [vmem:[#allocation2 + $0x8] sm:$0xff] }
  0x86   :  { %v61_v5 = vpop.f32.mrf.mxu0 }
  0x87   :  { %v66_v6 = vadd.f32 %v61_v5, %v23_v4 }
  0x89   :  { %69 = vst.msk [vmem:[#allocation2] sm:$0xff] %vm20_vm0, %v66_v6 }
  0x8e   :  { %v63_v9 = vpop.f32.mrf.mxu0 }
  0x8f   :  { %v67_v10 = vadd.f32 %v63_v9, %v24_v7 }
  0x90   :  { %v74_v11 = vld [vmem:[#allocation2] sm:$0xff] }
  0x91   :  { %70 = vst.msk [vmem:[#allocation2 + $0x8] sm:$0xff] %vm20_vm0, %v67_v10  ;;  %v80_v12 = vadd.f32 %v122_v8, %v74_v11 }
  0x93   :  { %82 = vst.msk [vmem:[#allocation3] sm:$0xff] %vm20_vm0, %v80_v12 }
  0x98   :  { %v75_v13 = vld [vmem:[#allocation2 + $0x8] sm:$0xff] }
  0x99   :  { %v81_v14 = vadd.f32 %v122_v8, %v75_v13 }
  0x9b   :  { %83 = vst.msk [vmem:[#allocation3 + $0x8] sm:$0xff] %vm20_vm0, %v81_v14 }
  0x9c   :  { %96 = dma.vmem_to_hbm [thread:$0]  %s89_s1, 256, %s91_s22, [#allocation4], %s151_s2, %s151_s2, %s152_s23  }
  0x9d   :  { %147 = dma.done.wait [#allocation4], 256  }
  0x9e   :  { %148 = vsyncadd [#allocation4], 4294967040 }
  0x9f   :  { %101 = vsyncpa [#allocation4], 1 }

// kernel: _lambda_.55
= control target key start
LH: loop header
LB: loop body
LE: loop exit
PB: predicated region body
PF: predicated region fallthrough
CT: control target
= control target key end

     0   :  { %vm19_vm0 = vcmask 523264   ;;  %v110_v1 = vmov 0.0   ;;  %vm47_vm1 = vcmask 261120   ;;  %vm85_vm2 = vcmask 519168   ;;  %s153_s1 = inlined_call_operand.vmem [shape: bf16[32,64], index: 1, kind: input, shape index: {}]   ;;  %s154_s2 = inlined_call_operand.vmem [shape: f32[1,64], index: 2, kind: input, shape index: {}]   ;;  %s155_s0 = inlined_call_operand.vmem [shape: bf16[16,32], index: 0, kind: input, shape index: {}]   ;;  %s156_s3 = inlined_call_operand.vmem [shape: bf16[16,64], index: 3, kind: output, shape index: {}]  }
   0x1   :  { %v107_v0 = vld [vmem:[%s153_s1 + $0x8] sm:$0xff]  ;;  %20 = vst.msk [vmem:[#allocation2] sm:$0xff] %vm19_vm0, %v110_v1  ;;  %v106_v2 = vld [vmem:[%s153_s1] sm:$0xff] }
   0x2   :  { %21 = vst.msk [vmem:[#allocation2 + $0x8] sm:$0xff] %vm19_vm0, %v110_v1  ;;  %57 = vmatpush.bf16.msra.mxu0 %v107_v0  ;;  %v105_v3 = vld [vmem:[%s155_s0] sm:$0xff] }
   0x3   :  { %v109_v8 = vld [vmem:[%s154_s2] ss:$0 sm:$0xff] }
   0x6   :  { %58 = vmatpush.bf16.msra.mxu0 %v106_v2 }
   0x8   :  { %v22_v4 = vld [vmem:[#allocation2] sm:$0xff] }
   0x9   :  { %104 = vmatmul.msk.bf16.vlgmr.msra.gmra.mxu0 %vm47_vm1, %v105_v3  ;;  %v23_v7 = vld [vmem:[#allocation2 + $0x8] sm:$0xff] }
  0x86   :  { %v60_v5 = vpop.f32.mrf.mxu0 }
  0x87   :  { %v65_v6 = vadd.f32 %v60_v5, %v22_v4 }
  0x89   :  { %68 = vst.msk [vmem:[#allocation2] sm:$0xff] %vm19_vm0, %v65_v6 }
  0x8e   :  { %v62_v9 = vpop.f32.mrf.mxu0 }
  0x8f   :  { %v66_v10 = vadd.f32 %v62_v9, %v23_v7 }
  0x90   :  { %v73_v11 = vld [vmem:[#allocation2] sm:$0xff] }
  0x91   :  { %v79_v12 = vadd.f32 %v109_v8, %v73_v11  ;;  %69 = vst.msk [vmem:[#allocation2 + $0x8] sm:$0xff] %vm19_vm0, %v66_v10 }
  0x93   :  { %v81_v13 = vmax.f32 %v79_v12, 0.0 }
  0x95   :  { %v83_v14 = vpack.c.bf16 %v81_v13, %v81_v13 }
  0x97   :  { %86 = vst.msk [vmem:[%s156_s3] sm:$0xf] %vm85_vm2, %v83_v14 }
  0x98   :  { %v74_v15 = vld [vmem:[#allocation2 + $0x8] sm:$0xff] }
  0x99   :  { %v80_v16 = vadd.f32 %v109_v8, %v74_v15 }
  0x9b   :  { %v82_v17 = vmax.f32 %v80_v16, 0.0 }
  0x9d   :  { %v84_v18 = vpack.c.bf16 %v82_v17, %v82_v17 }
  0x9f   :  { %87 = vst.msk [vmem:[%s156_s3 + $0x4] sm:$0xf] %vm85_vm2, %v84_v18 }

</bundles_post_ra>
